<compile_context>
chip_gen: v6e
topology: v6e:2x2x1
jax: 0.10.0
libtpu: 0.0.40
codegen_flags: <defaults>
</compile_context>

<pallas_src>
import functools

import jax
import jax.numpy as jnp
from jax import lax
from jax.experimental import pallas as pl
from jax.experimental.pallas import tpu as pltpu


# ----------------------------------------------------------------------------
# helpers
# ----------------------------------------------------------------------------
def _pick_tile(n, cap):
    """Largest multiple of 128 that divides `n`, at most `cap`; falls back to n."""
    if n % 128 != 0:
        return n
    t = min(cap, n)
    t -= t % 128
    while t >= 128:
        if n % t == 0:
            return t
        t -= 128
    return n


# ----------------------------------------------------------------------------
# Pallas kernels
# ----------------------------------------------------------------------------
def _deconv_kernel(x_ref, w_ref, b_ref, o_ref, *, groups):
    """Grouped ConvTranspose2d with stride == kernel_size (non-overlapping taps).

    All k*k output taps are produced by a single matmul per group:
      x_ref : (G, cin_g, TN)          spatial on the lane axis
      w_ref : (G, k*k*cout_g, cin_g)
      b_ref : (G, k*k*cout_g, 1)
      o_ref : (G, k*k*cout_g, TN)     row = tap*cout_g + co
    """
    for g in range(groups):            # static loop over contiguous channel groups
        o_ref[g] = (jnp.dot(w_ref[g], x_ref[g],
                            preferred_element_type=jnp.float32) + b_ref[g])


def _conv3x3_bn_relu_kernel(p_ref, w_ref, b_ref, gamma_ref, beta_ref, o_ref,
                            sum_ref, ssq_ref, scale_ref, shift_ref,
                            *, groups, n_total, eps):
    """Grouped Conv2d(3x3, pad=1) as one im2col matmul per group + BN + ReLU.

    Grid = (phase, spatial_tile).  Phase 0 streams all tiles and accumulates the
    per-channel sum / sum-of-squares (exact batch statistics across tiles);
    phase 1 recomputes each tile's conv output (cheap — MXU is otherwise idle)
    and applies normalize + affine + ReLU with the finalized statistics.

      p_ref : (G, 9*cin_g, TN)  im2col patches, spatial on the lane axis
      w_ref : (G, cout_g, 9*cin_g)
      b/gamma/beta : (G, cout_g, 1)
      o_ref : (G, cout_g, TN)
      sum/ssq/scale/shift : (G, cout_g, 1) VMEM scratch, persistent across grid
    """
    phase = pl.program_id(0)
    tile = pl.program_id(1)
    inv_n = 1.0 / n_total

    @pl.when((phase == 0) & (tile == 0))
    def _():
        sum_ref[...] = jnp.zeros_like(sum_ref)
        ssq_ref[...] = jnp.zeros_like(ssq_ref)

    @pl.when((phase == 1) & (tile == 0))
    def _():
        # Finalize batch statistics once (biased variance, as in nn.BatchNorm2d
        # training mode) and fold them with the affine params into scale/shift.
        mean = sum_ref[...] * inv_n
        var = jnp.maximum(ssq_ref[...] * inv_n - mean * mean, 0.0)
        scale = gamma_ref[...] * lax.rsqrt(var + eps)
        scale_ref[...] = scale
        shift_ref[...] = beta_ref[...] - mean * scale

    for g in range(groups):            # static loop over contiguous channel groups
        acc = jnp.dot(w_ref[g], p_ref[g], preferred_element_type=jnp.float32)
        acc = acc + b_ref[g]

        @pl.when(phase == 0)
        def _(acc=acc, g=g):
            sum_ref[g] += jnp.sum(acc, axis=1, keepdims=True)
            ssq_ref[g] += jnp.sum(acc * acc, axis=1, keepdims=True)

        @pl.when(phase == 1)
        def _(acc=acc, g=g):
            o_ref[g] = jnp.maximum(acc * scale_ref[g] + shift_ref[g], 0.0)


# ----------------------------------------------------------------------------
# pallas_call wrappers (channel-major: (C, B, H, W))
# ----------------------------------------------------------------------------
def conv_transpose2d(x_cm, weight, bias, *, groups, kernel_size, stride):
    """(Cin, B, H, W) -> (Cout, B, H*k, W*k), PyTorch ConvTranspose2d semantics."""
    # TODO(synk): only the non-overlapping case stride == kernel_size (used by this
    # DecoderBlock config) is implemented.
    assert stride == kernel_size, "only stride == kernel_size supported"
    cin, B, H, W = x_cm.shape
    k = kernel_size
    cin_g = cin // groups
    cout_g = weight.shape[1]           # PyTorch weight: (Cin, Cout//groups, k, k)
    cout = cout_g * groups
    n = B * H * W

    xg = x_cm.reshape(groups, cin_g, n)
    wg = weight.reshape(groups, cin_g, cout_g, k, k)
    wg = jnp.transpose(wg, (0, 3, 4, 2, 1)).reshape(groups, k * k * cout_g, cin_g)
    bg = jnp.broadcast_to(bias.reshape(groups, 1, cout_g), (groups, k * k, cout_g))
    bg = bg.reshape(groups, k * k * cout_g, 1)

    tn = _pick_tile(n, 512)
    rows = k * k * cout_g
    out = pl.pallas_call(
        functools.partial(_deconv_kernel, groups=groups),
        grid=(n // tn,),
        in_specs=[
            pl.BlockSpec((groups, cin_g, tn), lambda i: (0, 0, i)),
            pl.BlockSpec((groups, rows, cin_g), lambda i: (0, 0, 0)),
            pl.BlockSpec((groups, rows, 1), lambda i: (0, 0, 0)),
        ],
        out_specs=pl.BlockSpec((groups, rows, tn), lambda i: (0, 0, i)),
        out_shape=jax.ShapeDtypeStruct((groups, rows, n), jnp.float32),
        compiler_params=pltpu.CompilerParams(
            dimension_semantics=("parallel",),          # megacore on v7x
            vmem_limit_bytes=32 * 1024 * 1024),
    )(xg, wg, bg)

    # interleave taps back to spatial: (g, ki, kj, co, b, i, j) -> (c, b, i*k+ki, j*k+kj)
    out = out.reshape(groups, k, k, cout_g, B, H, W)
    out = jnp.transpose(out, (0, 3, 4, 5, 1, 6, 2)).reshape(cout, B, H * k, W * k)
    return out


def conv3x3_bn_relu(x_cm, weight, bias, gamma, beta, *, groups, eps=1e-5):
    """Fused grouped Conv2d(3x3, pad=1) + BatchNorm2d(batch stats) + ReLU.

    x_cm: (Cin, B, H, W) channel-major.  Returns (Cout, B, H, W).
    """
    cin, B, H, W = x_cm.shape
    cout = weight.shape[0]
    cin_g, cout_g = cin // groups, cout // groups
    n = B * H * W

    # im2col in the transposed layout: (groups, 9*cin_g, N), row = tap*cin_g + ci.
    # TODO(synk): fold the pad + shifted-window gather into the kernel with
    # pltpu.roll to avoid materializing the 9x patches in HBM.
    xpad = jnp.pad(x_cm, ((0, 0), (0, 0), (1, 1), (1, 1)))
    taps = [xpad[:, :, dy:dy + H, dx:dx + W] for dy in range(3) for dx in range(3)]
    patches = jnp.stack(taps, axis=0)                    # (9, Cin, B, H, W)
    patches = patches.reshape(9, groups, cin_g, n)
    patches = jnp.transpose(patches, (1, 0, 2, 3)).reshape(groups, 9 * cin_g, n)

    # per-group weights, row order (dy, dx, ci) matching the patches
    wflat = weight.reshape(groups, cout_g, cin_g, 3, 3)
    wflat = jnp.transpose(wflat, (0, 1, 3, 4, 2)).reshape(groups, cout_g, 9 * cin_g)

    tn = _pick_tile(n, 1024)
    grid = (2, n // tn)      # (phase, spatial tile); phase 0 = stats, phase 1 = write

    out = pl.pallas_call(
        functools.partial(_conv3x3_bn_relu_kernel, groups=groups, n_total=n, eps=eps),
        grid=grid,
        in_specs=[
            pl.BlockSpec((groups, 9 * cin_g, tn), lambda p, i: (0, 0, i)),
            pl.BlockSpec((groups, cout_g, 9 * cin_g), lambda p, i: (0, 0, 0)),
            pl.BlockSpec((groups, cout_g, 1), lambda p, i: (0, 0, 0)),
            pl.BlockSpec((groups, cout_g, 1), lambda p, i: (0, 0, 0)),
            pl.BlockSpec((groups, cout_g, 1), lambda p, i: (0, 0, 0)),
        ],
        # Phase 0 never writes the output; pinning its block index to 0 means the
        # output block only changes (and is written back) during phase 1, so each
        # output tile is DMA'd to HBM exactly once.
        out_specs=pl.BlockSpec((groups, cout_g, tn), lambda p, i: (0, 0, p * i)),
        out_shape=jax.ShapeDtypeStruct((groups, cout_g, n), jnp.float32),
        scratch_shapes=[pltpu.VMEM((groups, cout_g, 1), jnp.float32),   # sum
                        pltpu.VMEM((groups, cout_g, 1), jnp.float32),   # sumsq
                        pltpu.VMEM((groups, cout_g, 1), jnp.float32),   # scale
                        pltpu.VMEM((groups, cout_g, 1), jnp.float32)],  # shift
        compiler_params=pltpu.CompilerParams(
            # cross-tile BN reduction + phase dependency -> "arbitrary"
            dimension_semantics=("arbitrary", "arbitrary"),
            vmem_limit_bytes=32 * 1024 * 1024),
    )(patches, wflat,
      bias.reshape(groups, cout_g, 1),
      gamma.reshape(groups, cout_g, 1),
      beta.reshape(groups, cout_g, 1))
    return out.reshape(cout, B, H, W)


# ----------------------------------------------------------------------------
# parameters (deterministic, synthetic) + forward
# ----------------------------------------------------------------------------
def make_params(key, in_channels, out_channels, num_conv_layers, kernel_size,
                stride, num_groups, concat_channels=0):
    del stride
    keys = jax.random.split(key, 8)
    block_in = in_channels + concat_channels
    mid = (block_in + out_channels) // 2

    def conv_layer(kw, kb, c_out, c_in):
        return {
            "w": 0.1 * jax.random.normal(kw, (c_out, c_in // num_groups, 3, 3), jnp.float32),
            "b": 0.1 * jax.random.normal(kb, (c_out,), jnp.float32),
            "gamma": jnp.ones((c_out,), jnp.float32),   # BatchNorm2d default init
            "beta": jnp.zeros((c_out,), jnp.float32),
        }

    params = {
        # nn.ConvTranspose2d(in, in, kernel_size, groups=num_groups, stride=stride)
        "dec_w": 0.1 * jax.random.normal(
            keys[0], (in_channels, in_channels // num_groups, kernel_size, kernel_size),
            jnp.float32),
        "dec_b": 0.1 * jax.random.normal(keys[1], (in_channels,), jnp.float32),
    }
    first = conv_layer(keys[2], keys[3], mid, block_in)
    middle = conv_layer(keys[4], keys[5], mid, mid)      # PyTorch `*(n-2)` shares these
    last = conv_layer(keys[6], keys[7], out_channels, mid)
    params["block"] = [first] + [middle] * (num_conv_layers - 2) + [last]
    return params


def decoder_block_forward(params, x, x_to_concat=None, *, num_groups,
                          kernel_size, stride):
    # x, x_to_concat: NCHW (PyTorch convention); output: NCHW.
    # All Pallas compute runs channel-major (C, B, H, W) so the flattened spatial
    # axis sits on the TPU lane axis.
    x_cm = jnp.transpose(x, (1, 0, 2, 3)).astype(jnp.float32)
    y = conv_transpose2d(x_cm, params["dec_w"], params["dec_b"],
                         groups=num_groups, kernel_size=kernel_size, stride=stride)
    if x_to_concat is not None:
        xc = jnp.transpose(x_to_concat, (1, 0, 2, 3)).astype(jnp.float32)
        # TODO(synk): the skip concat could be fused into the first conv kernel as
        # an extra dot against the matching weight rows (channel-group-dependent).
        y = jnp.concatenate([y, xc], axis=0)             # == torch.cat(dim=1)
    for layer in params["block"]:
        y = conv3x3_bn_relu(y, layer["w"], layer["b"], layer["gamma"],
                            layer["beta"], groups=num_groups)
    return jnp.transpose(y, (1, 0, 2, 3))


# ----------------------------------------------------------------------------
if __name__ == "__main__":
    key = jax.random.PRNGKey(0)
    pkey, xkey, ckey = jax.random.split(key, 3)

    # DecoderBlock(in=4, out=8, num_conv_layers=2, kernel_size=2, stride=2,
    #              num_groups=2, concat_channels=4)
    in_channels, out_channels = 4, 8
    num_conv_layers, kernel_size, stride, num_groups = 2, 2, 2, 2
    concat_channels = 4
    B, H, W = 2, 16, 16

    params = make_params(pkey, in_channels, out_channels, num_conv_layers,
                         kernel_size, stride, num_groups, concat_channels)

    x = jax.random.normal(xkey, (B, in_channels, H, W), jnp.float32)
    x_to_concat = jax.random.normal(
        ckey, (B, concat_channels, H * stride, W * stride), jnp.float32)

    fwd = jax.jit(functools.partial(decoder_block_forward,
                                    num_groups=num_groups,
                                    kernel_size=kernel_size, stride=stride))
    out = fwd(params, x, x_to_concat)
    out = jax.block_until_ready(out)
    assert out.shape == (B, out_channels, H * stride, W * stride), out.shape
    assert bool(jnp.all(jnp.isfinite(out)))
    print("KERNEL_OK")
</pallas_src>

<mosaic_0001>
module attributes {stable_mosaic.version = 11 : i64} {
  func.func @_deconv_kernel(%arg0: i32, %arg1: memref<2x2x512xf32, #tpu.memory_space<vmem>>, %arg2: memref<2x8x2xf32, #tpu.memory_space<vmem>>, %arg3: memref<2x8x1xf32, #tpu.memory_space<vmem>>, %arg4: memref<2x8x512xf32, #tpu.memory_space<vmem>>) attributes {dimension_semantics = [#tpu.dimension_semantics<parallel>], iteration_bounds = array<i64: 1>, scalar_prefetch = 0 : i64, scratch_operands = 0 : i64, tpu.core_type = #tpu.core_type<tc>, window_params = [{transform_indices = @transform_0, window_bounds = array<i64: 2, 2, 512>}, {pipeline_mode = #tpu.pipeline_mode<synchronous>, transform_indices = @transform_1, window_bounds = array<i64: 2, 8, 2>}, {pipeline_mode = #tpu.pipeline_mode<synchronous>, transform_indices = @transform_2, window_bounds = array<i64: 2, 8, 1>}, {transform_indices = @transform_3, window_bounds = array<i64: 2, 8, 512>}]} {
    %c0 = arith.constant 0 : index
    %c0_0 = arith.constant 0 : index
    %c0_1 = arith.constant 0 : index
    %0 = vector.load %arg2[%c0, %c0_0, %c0_1] : memref<2x8x2xf32, #tpu.memory_space<vmem>>, vector<1x8x2xf32>
    %1 = vector.shape_cast %0 : vector<1x8x2xf32> to vector<8x2xf32>
    %c0_2 = arith.constant 0 : index
    %c0_3 = arith.constant 0 : index
    %c0_4 = arith.constant 0 : index
    %2 = vector.load %arg1[%c0_2, %c0_3, %c0_4] : memref<2x2x512xf32, #tpu.memory_space<vmem>>, vector<1x2x512xf32>
    %3 = vector.shape_cast %2 : vector<1x2x512xf32> to vector<2x512xf32>
    %cst = arith.constant dense<0.000000e+00> : vector<8x512xf32>
    %4 = tpu.matmul %1, %3, %cst {dimension_numbers = #tpu.dot_dimension_numbers<[1], [0], [0], [1], [0, 0, 1, 1], [], []>} : vector<8x2xf32>, vector<2x512xf32>, vector<8x512xf32> -> vector<8x512xf32>
    %c0_5 = arith.constant 0 : index
    %c0_6 = arith.constant 0 : index
    %c0_7 = arith.constant 0 : index
    %5 = vector.load %arg3[%c0_5, %c0_6, %c0_7] : memref<2x8x1xf32, #tpu.memory_space<vmem>>, vector<1x8x1xf32>
    %6 = vector.shape_cast %5 : vector<1x8x1xf32> to vector<8x1xf32>
    %7 = vector.broadcast %6 : vector<8x1xf32> to vector<8x512xf32>
    %8 = arith.addf %4, %7 : vector<8x512xf32>
    %c0_8 = arith.constant 0 : index
    %c0_9 = arith.constant 0 : index
    %c0_10 = arith.constant 0 : index
    %9 = vector.load %arg4[%c0_8, %c0_9, %c0_10] : memref<2x8x512xf32, #tpu.memory_space<vmem>>, vector<1x8x512xf32>
    %10 = vector.shape_cast %9 : vector<1x8x512xf32> to vector<8x512xf32>
    %11 = vector.shape_cast %8 : vector<8x512xf32> to vector<1x8x512xf32>
    tpu.vector_store %arg4[%c0_8, %c0_9, %c0_10], %11 {strides = array<i32>} : memref<2x8x512xf32, #tpu.memory_space<vmem>>, vector<1x8x512xf32>,
    %c1 = arith.constant 1 : index
    %c0_11 = arith.constant 0 : index
    %c0_12 = arith.constant 0 : index
    %12 = vector.load %arg2[%c1, %c0_11, %c0_12] : memref<2x8x2xf32, #tpu.memory_space<vmem>>, vector<1x8x2xf32>
    %13 = vector.shape_cast %12 : vector<1x8x2xf32> to vector<8x2xf32>
    %c1_13 = arith.constant 1 : index
    %c0_14 = arith.constant 0 : index
    %c0_15 = arith.constant 0 : index
    %14 = vector.load %arg1[%c1_13, %c0_14, %c0_15] : memref<2x2x512xf32, #tpu.memory_space<vmem>>, vector<1x2x512xf32>
    %15 = vector.shape_cast %14 : vector<1x2x512xf32> to vector<2x512xf32>
    %cst_16 = arith.constant dense<0.000000e+00> : vector<8x512xf32>
    %16 = tpu.matmul %13, %15, %cst_16 {dimension_numbers = #tpu.dot_dimension_numbers<[1], [0], [0], [1], [0, 0, 1, 1], [], []>} : vector<8x2xf32>, vector<2x512xf32>, vector<8x512xf32> -> vector<8x512xf32>
    %c1_17 = arith.constant 1 : index
    %c0_18 = arith.constant 0 : index
    %c0_19 = arith.constant 0 : index
    %17 = vector.load %arg3[%c1_17, %c0_18, %c0_19] : memref<2x8x1xf32, #tpu.memory_space<vmem>>, vector<1x8x1xf32>
    %18 = vector.shape_cast %17 : vector<1x8x1xf32> to vector<8x1xf32>
    %19 = vector.broadcast %18 : vector<8x1xf32> to vector<8x512xf32>
    %20 = arith.addf %16, %19 : vector<8x512xf32>
    %c1_20 = arith.constant 1 : index
    %c0_21 = arith.constant 0 : index
    %c0_22 = arith.constant 0 : index
    %21 = vector.load %arg4[%c1_20, %c0_21, %c0_22] : memref<2x8x512xf32, #tpu.memory_space<vmem>>, vector<1x8x512xf32>
    %22 = vector.shape_cast %21 : vector<1x8x512xf32> to vector<8x512xf32>
    %23 = vector.shape_cast %20 : vector<8x512xf32> to vector<1x8x512xf32>
    tpu.vector_store %arg4[%c1_20, %c0_21, %c0_22], %23 {strides = array<i32>} : memref<2x8x512xf32, #tpu.memory_space<vmem>>, vector<1x8x512xf32>,
    return
  }
  func.func @transform_0(%arg0: i32) -> (i32, i32, i32) {
    %c0_i32 = arith.constant 0 : i32
    %c0_i32_0 = arith.constant 0 : i32
    %c0_i32_1 = arith.constant 0 : i32
    return %c0_i32, %c0_i32_0, %arg0 : i32, i32, i32
  }
  func.func @transform_1(%arg0: i32) -> (i32, i32, i32) {
    %c0_i32 = arith.constant 0 : i32
    %c0_i32_0 = arith.constant 0 : i32
    %c0_i32_1 = arith.constant 0 : i32
    %c0_i32_2 = arith.constant 0 : i32
    return %c0_i32, %c0_i32_0, %c0_i32_1 : i32, i32, i32
  }
  func.func @transform_2(%arg0: i32) -> (i32, i32, i32) {
    %c0_i32 = arith.constant 0 : i32
    %c0_i32_0 = arith.constant 0 : i32
    %c0_i32_1 = arith.constant 0 : i32
    %c0_i32_2 = arith.constant 0 : i32
    return %c0_i32, %c0_i32_0, %c0_i32_1 : i32, i32, i32
  }
  func.func @transform_3(%arg0: i32) -> (i32, i32, i32) {
    %c0_i32 = arith.constant 0 : i32
    %c0_i32_0 = arith.constant 0 : i32
    %c0_i32_1 = arith.constant 0 : i32
    return %c0_i32, %c0_i32_0, %arg0 : i32, i32, i32
  }
}

module attributes {stable_mosaic.version = 11 : i64} {
  func.func @_conv3x3_bn_relu_kernel(%arg0: i32, %arg1: i32, %arg2: memref<2x36x1024xf32, #tpu.memory_space<vmem>>, %arg3: memref<2x4x36xf32, #tpu.memory_space<vmem>>, %arg4: memref<2x4x1xf32, #tpu.memory_space<vmem>>, %arg5: memref<2x4x1xf32, #tpu.memory_space<vmem>>, %arg6: memref<2x4x1xf32, #tpu.memory_space<vmem>>, %arg7: memref<2x4x1024xf32, #tpu.memory_space<vmem>>, %arg8: memref<2x4x1xf32, #tpu.memory_space<vmem>>, %arg9: memref<2x4x1xf32, #tpu.memory_space<vmem>>, %arg10: memref<2x4x1xf32, #tpu.memory_space<vmem>>, %arg11: memref<2x4x1xf32, #tpu.memory_space<vmem>>) attributes {dimension_semantics = [#tpu.dimension_semantics<arbitrary>, #tpu.dimension_semantics<arbitrary>], iteration_bounds = array<i64: 2, 2>, scalar_prefetch = 0 : i64, scratch_operands = 4 : i64, tpu.core_type = #tpu.core_type<tc>, window_params = [{transform_indices = @transform_0, window_bounds = array<i64: 2, 36, 1024>}, {pipeline_mode = #tpu.pipeline_mode<synchronous>, transform_indices = @transform_1, window_bounds = array<i64: 2, 4, 36>}, {pipeline_mode = #tpu.pipeline_mode<synchronous>, transform_indices = @transform_2, window_bounds = array<i64: 2, 4, 1>}, {pipeline_mode = #tpu.pipeline_mode<synchronous>, transform_indices = @transform_3, window_bounds = array<i64: 2, 4, 1>}, {pipeline_mode = #tpu.pipeline_mode<synchronous>, transform_indices = @transform_4, window_bounds = array<i64: 2, 4, 1>}, {transform_indices = @transform_5, window_bounds = array<i64: 2, 4, 1024>}]} {
    %c0_i32 = arith.constant 0 : i32
    %0 = arith.cmpi eq, %arg0, %c0_i32 : i32
    %c0_i32_0 = arith.constant 0 : i32
    %1 = arith.cmpi eq, %arg1, %c0_i32_0 : i32
    %2 = arith.andi %0, %1 : i1
    %3 = arith.extui %2 : i1 to i32
    %c0_i32_1 = arith.constant 0 : i32
    %4 = arith.cmpi ne, %3, %c0_i32_1 : i32
    scf.if %4 {
      %cst_29 = arith.constant 0.000000e+00 : f32
      %40 = vector.broadcast %cst_29 : f32 to vector<2x4x1xf32>
      %c0_30 = arith.constant 0 : index
      %c0_31 = arith.constant 0 : index
      %c0_32 = arith.constant 0 : index
      %41 = vector.load %arg8[%c0_30, %c0_31, %c0_32] : memref<2x4x1xf32, #tpu.memory_space<vmem>>, vector<2x4x1xf32>
      tpu.vector_store %arg8[%c0_30, %c0_31, %c0_32], %40 {strides = array<i32>} : memref<2x4x1xf32, #tpu.memory_space<vmem>>, vector<2x4x1xf32>,
      %cst_33 = arith.constant 0.000000e+00 : f32
      %42 = vector.broadcast %cst_33 : f32 to vector<2x4x1xf32>
      %c0_34 = arith.constant 0 : index
      %c0_35 = arith.constant 0 : index
      %c0_36 = arith.constant 0 : index
      %43 = vector.load %arg9[%c0_34, %c0_35, %c0_36] : memref<2x4x1xf32, #tpu.memory_space<vmem>>, vector<2x4x1xf32>
      tpu.vector_store %arg9[%c0_34, %c0_35, %c0_36], %42 {strides = array<i32>} : memref<2x4x1xf32, #tpu.memory_space<vmem>>, vector<2x4x1xf32>,
    } else {
    }
    %c1_i32 = arith.constant 1 : i32
    %5 = arith.cmpi eq, %arg0, %c1_i32 : i32
    %c0_i32_2 = arith.constant 0 : i32
    %6 = arith.cmpi eq, %arg1, %c0_i32_2 : i32
    %7 = arith.andi %5, %6 : i1
    %8 = arith.extui %7 : i1 to i32
    %c0_i32_3 = arith.constant 0 : i32
    %9 = arith.cmpi ne, %8, %c0_i32_3 : i32
    scf.if %9 {
      %c0_29 = arith.constant 0 : index
      %c0_30 = arith.constant 0 : index
      %c0_31 = arith.constant 0 : index
      %40 = vector.load %arg8[%c0_29, %c0_30, %c0_31] : memref<2x4x1xf32, #tpu.memory_space<vmem>>, vector<2x4x1xf32>
      %cst_32 = arith.constant 4.8828125E-4 : f32
      %41 = vector.broadcast %cst_32 : f32 to vector<2x4x1xf32>
      %42 = arith.mulf %40, %41 : vector<2x4x1xf32>
      %c0_33 = arith.constant 0 : index
      %c0_34 = arith.constant 0 : index
      %c0_35 = arith.constant 0 : index
      %43 = vector.load %arg9[%c0_33, %c0_34, %c0_35] : memref<2x4x1xf32, #tpu.memory_space<vmem>>, vector<2x4x1xf32>
      %cst_36 = arith.constant 4.8828125E-4 : f32
      %44 = vector.broadcast %cst_36 : f32 to vector<2x4x1xf32>
      %45 = arith.mulf %43, %44 : vector<2x4x1xf32>
      %46 = arith.mulf %42, %42 : vector<2x4x1xf32>
      %47 = arith.subf %45, %46 : vector<2x4x1xf32>
      %cst_37 = arith.constant 0.000000e+00 : f32
      %48 = vector.broadcast %cst_37 : f32 to vector<2x4x1xf32>
      %49 = arith.maximumf %47, %48 : vector<2x4x1xf32>
      %c0_38 = arith.constant 0 : index
      %c0_39 = arith.constant 0 : index
      %c0_40 = arith.constant 0 : index
      %50 = vector.load %arg5[%c0_38, %c0_39, %c0_40] : memref<2x4x1xf32, #tpu.memory_space<vmem>>, vector<2x4x1xf32>
      %cst_41 = arith.constant 9.99999974E-6 : f32
      %51 = vector.broadcast %cst_41 : f32 to vector<2x4x1xf32>
      %52 = arith.addf %49, %51 : vector<2x4x1xf32>
      %53 = math.rsqrt %52 : vector<2x4x1xf32>
      %54 = arith.mulf %50, %53 : vector<2x4x1xf32>
      %c0_42 = arith.constant 0 : index
      %c0_43 = arith.constant 0 : index
      %c0_44 = arith.constant 0 : index
      %55 = vector.load %arg10[%c0_42, %c0_43, %c0_44] : memref<2x4x1xf32, #tpu.memory_space<vmem>>, vector<2x4x1xf32>
      tpu.vector_store %arg10[%c0_42, %c0_43, %c0_44], %54 {strides = array<i32>} : memref<2x4x1xf32, #tpu.memory_space<vmem>>, vector<2x4x1xf32>,
      %c0_45 = arith.constant 0 : index
      %c0_46 = arith.constant 0 : index
      %c0_47 = arith.constant 0 : index
      %56 = vector.load %arg6[%c0_45, %c0_46, %c0_47] : memref<2x4x1xf32, #tpu.memory_space<vmem>>, vector<2x4x1xf32>
      %57 = arith.mulf %42, %54 : vector<2x4x1xf32>
      %58 = arith.subf %56, %57 : vector<2x4x1xf32>
      %c0_48 = arith.constant 0 : index
      %c0_49 = arith.constant 0 : index
      %c0_50 = arith.constant 0 : index
      %59 = vector.load %arg11[%c0_48, %c0_49, %c0_50] : memref<2x4x1xf32, #tpu.memory_space<vmem>>, vector<2x4x1xf32>
      tpu.vector_store %arg11[%c0_48, %c0_49, %c0_50], %58 {strides = array<i32>} : memref<2x4x1xf32, #tpu.memory_space<vmem>>, vector<2x4x1xf32>,
    } else {
    }
    %c0 = arith.constant 0 : index
    %c0_4 = arith.constant 0 : index
    %c0_5 = arith.constant 0 : index
    %10 = vector.load %arg3[%c0, %c0_4, %c0_5] : memref<2x4x36xf32, #tpu.memory_space<vmem>>, vector<1x4x36xf32>
    %11 = vector.shape_cast %10 : vector<1x4x36xf32> to vector<4x36xf32>
    %c0_6 = arith.constant 0 : index
    %c0_7 = arith.constant 0 : index
    %c0_8 = arith.constant 0 : index
    %12 = vector.load %arg2[%c0_6, %c0_7, %c0_8] : memref<2x36x1024xf32, #tpu.memory_space<vmem>>, vector<1x36x1024xf32>
    %13 = vector.shape_cast %12 : vector<1x36x1024xf32> to vector<36x1024xf32>
    %cst = arith.constant dense<0.000000e+00> : vector<4x1024xf32>
    %14 = tpu.matmul %11, %13, %cst {dimension_numbers = #tpu.dot_dimension_numbers<[1], [0], [0], [1], [0, 0, 1, 1], [], []>} : vector<4x36xf32>, vector<36x1024xf32>, vector<4x1024xf32> -> vector<4x1024xf32>
    %c0_9 = arith.constant 0 : index
    %c0_10 = arith.constant 0 : index
    %c0_11 = arith.constant 0 : index
    %15 = vector.load %arg4[%c0_9, %c0_10, %c0_11] : memref<2x4x1xf32, #tpu.memory_space<vmem>>, vector<1x4x1xf32>
    %16 = vector.shape_cast %15 : vector<1x4x1xf32> to vector<4x1xf32>
    %17 = vector.broadcast %16 : vector<4x1xf32> to vector<4x1024xf32>
    %18 = arith.addf %14, %17 : vector<4x1024xf32>
    %c0_i32_12 = arith.constant 0 : i32
    %19 = arith.cmpi eq, %arg0, %c0_i32_12 : i32
    %20 = arith.extui %19 : i1 to i32
    %c0_i32_13 = arith.constant 0 : i32
    %21 = arith.cmpi ne, %20, %c0_i32_13 : i32
    scf.if %21 {
      %c0_29 = arith.constant 0 : index
      %c0_30 = arith.constant 0 : index
      %c0_31 = arith.constant 0 : index
      %40 = vector.load %arg8[%c0_29, %c0_30, %c0_31] : memref<2x4x1xf32, #tpu.memory_space<vmem>>, vector<1x4x1xf32>
      %41 = vector.shape_cast %40 : vector<1x4x1xf32> to vector<4x1xf32>
      %cst_32 = arith.constant dense<0.000000e+00> : vector<4xf32>
      %42 = vector.multi_reduction <add>, %18, %cst_32 [1] : vector<4x1024xf32> to vector<4xf32>
      %43 = vector.shape_cast %42 : vector<4xf32> to vector<4x1xf32>
      %44 = arith.addf %41, %43 : vector<4x1xf32>
      %c0_33 = arith.constant 0 : index
      %c0_34 = arith.constant 0 : index
      %c0_35 = arith.constant 0 : index
      %45 = vector.load %arg8[%c0_33, %c0_34, %c0_35] : memref<2x4x1xf32, #tpu.memory_space<vmem>>, vector<1x4x1xf32>
      %46 = vector.shape_cast %45 : vector<1x4x1xf32> to vector<4x1xf32>
      %47 = vector.shape_cast %44 : vector<4x1xf32> to vector<1x4x1xf32>
      tpu.vector_store %arg8[%c0_33, %c0_34, %c0_35], %47 {strides = array<i32>} : memref<2x4x1xf32, #tpu.memory_space<vmem>>, vector<1x4x1xf32>,
      %c0_36 = arith.constant 0 : index
      %c0_37 = arith.constant 0 : index
      %c0_38 = arith.constant 0 : index
      %48 = vector.load %arg9[%c0_36, %c0_37, %c0_38] : memref<2x4x1xf32, #tpu.memory_space<vmem>>, vector<1x4x1xf32>
      %49 = vector.shape_cast %48 : vector<1x4x1xf32> to vector<4x1xf32>
      %50 = arith.mulf %18, %18 : vector<4x1024xf32>
      %cst_39 = arith.constant dense<0.000000e+00> : vector<4xf32>
      %51 = vector.multi_reduction <add>, %50, %cst_39 [1] : vector<4x1024xf32> to vector<4xf32>
      %52 = vector.shape_cast %51 : vector<4xf32> to vector<4x1xf32>
      %53 = arith.addf %49, %52 : vector<4x1xf32>
      %c0_40 = arith.constant 0 : index
      %c0_41 = arith.constant 0 : index
      %c0_42 = arith.constant 0 : index
      %54 = vector.load %arg9[%c0_40, %c0_41, %c0_42] : memref<2x4x1xf32, #tpu.memory_space<vmem>>, vector<1x4x1xf32>
      %55 = vector.shape_cast %54 : vector<1x4x1xf32> to vector<4x1xf32>
      %56 = vector.shape_cast %53 : vector<4x1xf32> to vector<1x4x1xf32>
      tpu.vector_store %arg9[%c0_40, %c0_41, %c0_42], %56 {strides = array<i32>} : memref<2x4x1xf32, #tpu.memory_space<vmem>>, vector<1x4x1xf32>,
    } else {
    }
    %c1_i32_14 = arith.constant 1 : i32
    %22 = arith.cmpi eq, %arg0, %c1_i32_14 : i32
    %23 = arith.extui %22 : i1 to i32
    %c0_i32_15 = arith.constant 0 : i32
    %24 = arith.cmpi ne, %23, %c0_i32_15 : i32
    scf.if %24 {
      %c0_29 = arith.constant 0 : index
      %c0_30 = arith.constant 0 : index
      %c0_31 = arith.constant 0 : index
      %40 = vector.load %arg10[%c0_29, %c0_30, %c0_31] : memref<2x4x1xf32, #tpu.memory_space<vmem>>, vector<1x4x1xf32>
      %41 = vector.shape_cast %40 : vector<1x4x1xf32> to vector<4x1xf32>
      %42 = vector.broadcast %41 : vector<4x1xf32> to vector<4x1024xf32>
      %43 = arith.mulf %18, %42 : vector<4x1024xf32>
      %c0_32 = arith.constant 0 : index
      %c0_33 = arith.constant 0 : index
      %c0_34 = arith.constant 0 : index
      %44 = vector.load %arg11[%c0_32, %c0_33, %c0_34] : memref<2x4x1xf32, #tpu.memory_space<vmem>>, vector<1x4x1xf32>
      %45 = vector.shape_cast %44 : vector<1x4x1xf32> to vector<4x1xf32>
      %46 = vector.broadcast %45 : vector<4x1xf32> to vector<4x1024xf32>
      %47 = arith.addf %43, %46 : vector<4x1024xf32>
      %cst_35 = arith.constant 0.000000e+00 : f32
      %48 = vector.broadcast %cst_35 : f32 to vector<4x1024xf32>
      %49 = arith.maximumf %47, %48 : vector<4x1024xf32>
      %c0_36 = arith.constant 0 : index
      %c0_37 = arith.constant 0 : index
      %c0_38 = arith.constant 0 : index
      %50 = vector.load %arg7[%c0_36, %c0_37, %c0_38] : memref<2x4x1024xf32, #tpu.memory_space<vmem>>, vector<1x4x1024xf32>
      %51 = vector.shape_cast %50 : vector<1x4x1024xf32> to vector<4x1024xf32>
      %52 = vector.shape_cast %49 : vector<4x1024xf32> to vector<1x4x1024xf32>
      tpu.vector_store %arg7[%c0_36, %c0_37, %c0_38], %52 {strides = array<i32>} : memref<2x4x1024xf32, #tpu.memory_space<vmem>>, vector<1x4x1024xf32>,
    } else {
    }
    %c1 = arith.constant 1 : index
    %c0_16 = arith.constant 0 : index
    %c0_17 = arith.constant 0 : index
    %25 = vector.load %arg3[%c1, %c0_16, %c0_17] : memref<2x4x36xf32, #tpu.memory_space<vmem>>, vector<1x4x36xf32>
    %26 = vector.shape_cast %25 : vector<1x4x36xf32> to vector<4x36xf32>
    %c1_18 = arith.constant 1 : index
    %c0_19 = arith.constant 0 : index
    %c0_20 = arith.constant 0 : index
    %27 = vector.load %arg2[%c1_18, %c0_19, %c0_20] : memref<2x36x1024xf32, #tpu.memory_space<vmem>>, vector<1x36x1024xf32>
    %28 = vector.shape_cast %27 : vector<1x36x1024xf32> to vector<36x1024xf32>
    %cst_21 = arith.constant dense<0.000000e+00> : vector<4x1024xf32>
    %29 = tpu.matmul %26, %28, %cst_21 {dimension_numbers = #tpu.dot_dimension_numbers<[1], [0], [0], [1], [0, 0, 1, 1], [], []>} : vector<4x36xf32>, vector<36x1024xf32>, vector<4x1024xf32> -> vector<4x1024xf32>
    %c1_22 = arith.constant 1 : index
    %c0_23 = arith.constant 0 : index
    %c0_24 = arith.constant 0 : index
    %30 = vector.load %arg4[%c1_22, %c0_23, %c0_24] : memref<2x4x1xf32, #tpu.memory_space<vmem>>, vector<1x4x1xf32>
    %31 = vector.shape_cast %30 : vector<1x4x1xf32> to vector<4x1xf32>
    %32 = vector.broadcast %31 : vector<4x1xf32> to vector<4x1024xf32>
    %33 = arith.addf %29, %32 : vector<4x1024xf32>
    %c0_i32_25 = arith.constant 0 : i32
    %34 = arith.cmpi eq, %arg0, %c0_i32_25 : i32
    %35 = arith.extui %34 : i1 to i32
    %c0_i32_26 = arith.constant 0 : i32
    %36 = arith.cmpi ne, %35, %c0_i32_26 : i32
    scf.if %36 {
      %c1_29 = arith.constant 1 : index
      %c0_30 = arith.constant 0 : index
      %c0_31 = arith.constant 0 : index
      %40 = vector.load %arg8[%c1_29, %c0_30, %c0_31] : memref<2x4x1xf32, #tpu.memory_space<vmem>>, vector<1x4x1xf32>
      %41 = vector.shape_cast %40 : vector<1x4x1xf32> to vector<4x1xf32>
      %cst_32 = arith.constant dense<0.000000e+00> : vector<4xf32>
      %42 = vector.multi_reduction <add>, %33, %cst_32 [1] : vector<4x1024xf32> to vector<4xf32>
      %43 = vector.shape_cast %42 : vector<4xf32> to vector<4x1xf32>
      %44 = arith.addf %41, %43 : vector<4x1xf32>
      %c1_33 = arith.constant 1 : index
      %c0_34 = arith.constant 0 : index
      %c0_35 = arith.constant 0 : index
      %45 = vector.load %arg8[%c1_33, %c0_34, %c0_35] : memref<2x4x1xf32, #tpu.memory_space<vmem>>, vector<1x4x1xf32>
      %46 = vector.shape_cast %45 : vector<1x4x1xf32> to vector<4x1xf32>
      %47 = vector.shape_cast %44 : vector<4x1xf32> to vector<1x4x1xf32>
      tpu.vector_store %arg8[%c1_33, %c0_34, %c0_35], %47 {strides = array<i32>} : memref<2x4x1xf32, #tpu.memory_space<vmem>>, vector<1x4x1xf32>,
      %c1_36 = arith.constant 1 : index
      %c0_37 = arith.constant 0 : index
      %c0_38 = arith.constant 0 : index
      %48 = vector.load %arg9[%c1_36, %c0_37, %c0_38] : memref<2x4x1xf32, #tpu.memory_space<vmem>>, vector<1x4x1xf32>
      %49 = vector.shape_cast %48 : vector<1x4x1xf32> to vector<4x1xf32>
      %50 = arith.mulf %33, %33 : vector<4x1024xf32>
      %cst_39 = arith.constant dense<0.000000e+00> : vector<4xf32>
      %51 = vector.multi_reduction <add>, %50, %cst_39 [1] : vector<4x1024xf32> to vector<4xf32>
      %52 = vector.shape_cast %51 : vector<4xf32> to vector<4x1xf32>
      %53 = arith.addf %49, %52 : vector<4x1xf32>
      %c1_40 = arith.constant 1 : index
      %c0_41 = arith.constant 0 : index
      %c0_42 = arith.constant 0 : index
      %54 = vector.load %arg9[%c1_40, %c0_41, %c0_42] : memref<2x4x1xf32, #tpu.memory_space<vmem>>, vector<1x4x1xf32>
      %55 = vector.shape_cast %54 : vector<1x4x1xf32> to vector<4x1xf32>
      %56 = vector.shape_cast %53 : vector<4x1xf32> to vector<1x4x1xf32>
      tpu.vector_store %arg9[%c1_40, %c0_41, %c0_42], %56 {strides = array<i32>} : memref<2x4x1xf32, #tpu.memory_space<vmem>>, vector<1x4x1xf32>,
    } else {
    }
    %c1_i32_27 = arith.constant 1 : i32
    %37 = arith.cmpi eq, %arg0, %c1_i32_27 : i32
    %38 = arith.extui %37 : i1 to i32
    %c0_i32_28 = arith.constant 0 : i32
    %39 = arith.cmpi ne, %38, %c0_i32_28 : i32
    scf.if %39 {
      %c1_29 = arith.constant 1 : index
      %c0_30 = arith.constant 0 : index
      %c0_31 = arith.constant 0 : index
      %40 = vector.load %arg10[%c1_29, %c0_30, %c0_31] : memref<2x4x1xf32, #tpu.memory_space<vmem>>, vector<1x4x1xf32>
      %41 = vector.shape_cast %40 : vector<1x4x1xf32> to vector<4x1xf32>
      %42 = vector.broadcast %41 : vector<4x1xf32> to vector<4x1024xf32>
      %43 = arith.mulf %33, %42 : vector<4x1024xf32>
      %c1_32 = arith.constant 1 : index
      %c0_33 = arith.constant 0 : index
      %c0_34 = arith.constant 0 : index
      %44 = vector.load %arg11[%c1_32, %c0_33, %c0_34] : memref<2x4x1xf32, #tpu.memory_space<vmem>>, vector<1x4x1xf32>
      %45 = vector.shape_cast %44 : vector<1x4x1xf32> to vector<4x1xf32>
      %46 = vector.broadcast %45 : vector<4x1xf32> to vector<4x1024xf32>
      %47 = arith.addf %43, %46 : vector<4x1024xf32>
      %cst_35 = arith.constant 0.000000e+00 : f32
      %48 = vector.broadcast %cst_35 : f32 to vector<4x1024xf32>
      %49 = arith.maximumf %47, %48 : vector<4x1024xf32>
      %c1_36 = arith.constant 1 : index
      %c0_37 = arith.constant 0 : index
      %c0_38 = arith.constant 0 : index
      %50 = vector.load %arg7[%c1_36, %c0_37, %c0_38] : memref<2x4x1024xf32, #tpu.memory_space<vmem>>, vector<1x4x1024xf32>
      %51 = vector.shape_cast %50 : vector<1x4x1024xf32> to vector<4x1024xf32>
      %52 = vector.shape_cast %49 : vector<4x1024xf32> to vector<1x4x1024xf32>
      tpu.vector_store %arg7[%c1_36, %c0_37, %c0_38], %52 {strides = array<i32>} : memref<2x4x1024xf32, #tpu.memory_space<vmem>>, vector<1x4x1024xf32>,
    } else {
    }
    return
  }
  func.func @transform_0(%arg0: i32, %arg1: i32) -> (i32, i32, i32) {
    %c0_i32 = arith.constant 0 : i32
    %c0_i32_0 = arith.constant 0 : i32
    %c0_i32_1 = arith.constant 0 : i32
    return %c0_i32, %c0_i32_0, %arg1 : i32, i32, i32
  }
  func.func @transform_1(%arg0: i32, %arg1: i32) -> (i32, i32, i32) {
    %c0_i32 = arith.constant 0 : i32
    %c0_i32_0 = arith.constant 0 : i32
    %c0_i32_1 = arith.constant 0 : i32
    %c0_i32_2 = arith.constant 0 : i32
    return %c0_i32, %c0_i32_0, %c0_i32_1 : i32, i32, i32
  }
  func.func @transform_2(%arg0: i32, %arg1: i32) -> (i32, i32, i32) {
    %c0_i32 = arith.constant 0 : i32
    %c0_i32_0 = arith.constant 0 : i32
    %c0_i32_1 = arith.constant 0 : i32
    %c0_i32_2 = arith.constant 0 : i32
    return %c0_i32, %c0_i32_0, %c0_i32_1 : i32, i32, i32
  }
  func.func @transform_3(%arg0: i32, %arg1: i32) -> (i32, i32, i32) {
    %c0_i32 = arith.constant 0 : i32
    %c0_i32_0 = arith.constant 0 : i32
    %c0_i32_1 = arith.constant 0 : i32
    %c0_i32_2 = arith.constant 0 : i32
    return %c0_i32, %c0_i32_0, %c0_i32_1 : i32, i32, i32
  }
  func.func @transform_4(%arg0: i32, %arg1: i32) -> (i32, i32, i32) {
    %c0_i32 = arith.constant 0 : i32
    %c0_i32_0 = arith.constant 0 : i32
    %c0_i32_1 = arith.constant 0 : i32
    %c0_i32_2 = arith.constant 0 : i32
    return %c0_i32, %c0_i32_0, %c0_i32_1 : i32, i32, i32
  }
  func.func @transform_5(%arg0: i32, %arg1: i32) -> (i32, i32, i32) {
    %0 = arith.muli %arg0, %arg1 : i32
    %c0_i32 = arith.constant 0 : i32
    %c0_i32_0 = arith.constant 0 : i32
    %c0_i32_1 = arith.constant 0 : i32
    return %c0_i32, %c0_i32_0, %0 : i32, i32, i32
  }
}

</mosaic_0001>

<bundles_post_ra>
// kernel: decoder_block_forward.3
= control target key start
LH: loop header
LB: loop body
LE: loop exit
PB: predicated region body
PF: predicated region fallthrough
CT: control target
= control target key end

     0   :  { %v27_v0 = vlaneseq  ;;  %v415_v2 = vmov 1983009808   ;;  %v416_v5 = vmov 0.0   ;;  %v417_v7 = vmov 0   ;;  %s492_s0 = inlined_call_operand.vmem [shape: f32[2,2,512], index: 0, kind: input, shape index: {}]   ;;  %s493_s2 = inlined_call_operand.vmem [shape: f32[2,8,1], index: 2, kind: input, shape index: {}]   ;;  %s494_s1 = inlined_call_operand.vmem [shape: f32[2,8,2], index: 1, kind: input, shape index: {}]   ;;  %s495_s3 = inlined_call_operand.vmem [shape: f32[2,8,512], index: 3, kind: output, shape index: {}]  }
   0x1   :  { %v15_v1 = vld [vmem:[%s492_s0] sm:$0xff]  ;;  %v25_v3 = vunpack.c.l.s4 %v415_v2  ;;  %v397_v4 = vld [vmem:[%s492_s0 + $0x8] sm:$0xff]  ;;  %117 = vmatprep.mubr.f32.mxu0 %v416_v5  ;;  %188 = vmatprep.mubr.f32.mxu1 %v416_v5  ;;  %vm44_vm0 = vcmask 1041408   ;;  %vm40_vm1 = vcmask 15360  }
   0x2   :  { %v28_v6 = vshrl.u32 %v27_v0, 7  ;;  %412 = vset.pattern.permute.xlu0 %v417_v7  ;;  %v16_v8 = vld [vmem:[%s493_s2] sm:$0xff]  ;;  %v211_v10 = vcombine.high %v397_v4, %v397_v4  ;;  %v23_v11 = vcombine.high %v15_v1, %v15_v1  ;;  %v398_v12 = vld [vmem:[%s493_s2 + $0x8] sm:$0xff] }
   0x3   :  { %v26_v9 = vunpack.c.0.s8 %v25_v3  ;;  %19 = vperm.xlu0 %412, %v16_v8   ;;  %v14_v20 = vld [vmem:[%s494_s1] sm:$0xff]  ;;  %v396_v23 = vld [vmem:[%s494_s1 + $0x8] sm:$0xff] }
   0x5   :  { %v29_v13 = vsub.s32 %v26_v9, %v28_v6 }
   0x7   :  { %v30_v14 = vrot.slane %v15_v1, %v29_v13  ;;  %v218_v15 = vrot.slane %v397_v4, %v29_v13  ;;  %v37_v16 = vrot.slane %v23_v11, %v29_v13  ;;  %v225_v17 = vrot.slane %v211_v10, %v29_v13  ;;  %207 = vperm.xlu0 %412, %v398_v12  }
   0x9   :  { %v38_v18 = vcombine.high %v30_v14, %v30_v14  ;;  %v39_v19 = vcombine.high %v37_v16, %v37_v16  ;;  %v226_v21 = vcombine.high %v218_v15, %v218_v15  ;;  %v227_v22 = vcombine.high %v225_v17, %v225_v17 }
   0xb   :  { %390 = vmatprep.subr.msk.mxu0 %vm44_vm0, %v38_v18  ;;  %393 = vmatprep.subr.msk.mxu1 %vm44_vm0, %v39_v19 }
   0xc   :  { %391 = vmatpush1.msk.msra.mxu0 %vm44_vm0, %v30_v14  ;;  %394 = vmatpush1.msk.msra.mxu1 %vm44_vm0, %v37_v16 }
   0xd   :  { %392 = vmatmul.mubr.msk.f32.vlgmr.msra.gmra.mxu0 %vm40_vm1, %v14_v20  ;;  %395 = vmatmul.mubr.msk.f32.vlgmr.msra.gmra.mxu1 %vm40_vm1, %v14_v20 }
   0xe   :  { %399 = vmatprep.subr.msk.mxu0 %vm44_vm0, %v226_v21  ;;  %402 = vmatprep.subr.msk.mxu1 %vm44_vm0, %v227_v22 }
   0xf   :  { %400 = vmatpush1.msk.msra.mxu0 %vm44_vm0, %v218_v15  ;;  %403 = vmatpush1.msk.msra.mxu1 %vm44_vm0, %v225_v17 }
  0x10   :  { %303 = vmatprep.mubr.f32.mxu0 %v416_v5  ;;  %374 = vmatprep.mubr.f32.mxu1 %v416_v5 }
  0x11   :  { %401 = vmatmul.mubr.msk.f32.vlgmr.msra.gmra.mxu0 %vm40_vm1, %v396_v23  ;;  %404 = vmatmul.mubr.msk.f32.vlgmr.msra.gmra.mxu1 %vm40_vm1, %v396_v23 }
  0x7e   :  { %v20_v24 = vpop.permute.xlu0 %19 }
  0x82   :  { %v208_v33 = vpop.permute.xlu0 %207 }
  0xcd   :  { %v119_v25 = vpop.f32.mrf.mxu0  ;;  %v190_v26 = vpop.f32.mrf.mxu1 }
  0xce   :  { %v120_v27 = vadd.f32 %v119_v25, %v20_v24  ;;  %v191_v28 = vadd.f32 %v190_v26, %v20_v24 }
  0xcf   :  { %v121_v29 = vpop.f32.mrf.mxu0  ;;  %v192_v30 = vpop.f32.mrf.mxu1 }
  0xd0   :  { %195 = vst [vmem:[%s495_s3] sm:$0xff] %v120_v27  ;;  %197 = vst [vmem:[%s495_s3 + $0x10] sm:$0xff] %v191_v28  ;;  %v122_v31 = vadd.f32 %v121_v29, %v20_v24  ;;  %v193_v32 = vadd.f32 %v192_v30, %v20_v24 }
  0xd1   :  { %v305_v34 = vpop.f32.mrf.mxu0  ;;  %v376_v35 = vpop.f32.mrf.mxu1 }
  0xd2   :  { %196 = vst [vmem:[%s495_s3 + $0x8] sm:$0xff] %v122_v31  ;;  %198 = vst [vmem:[%s495_s3 + $0x18] sm:$0xff] %v193_v32  ;;  %v306_v36 = vadd.f32 %v305_v34, %v208_v33  ;;  %v377_v37 = vadd.f32 %v376_v35, %v208_v33 }
  0xd3   :  { %v307_v38 = vpop.f32.mrf.mxu0  ;;  %v378_v39 = vpop.f32.mrf.mxu1 }
  0xd4   :  { %405 = vst [vmem:[%s495_s3 + $0x20] sm:$0xff] %v306_v36  ;;  %407 = vst [vmem:[%s495_s3 + $0x30] sm:$0xff] %v377_v37  ;;  %v308_v40 = vadd.f32 %v307_v38, %v208_v33  ;;  %v379_v41 = vadd.f32 %v378_v39, %v208_v33 }
  0xd6   :  { %406 = vst [vmem:[%s495_s3 + $0x28] sm:$0xff] %v308_v40  ;;  %408 = vst [vmem:[%s495_s3 + $0x38] sm:$0xff] %v379_v41 }

// kernel: decoder_block_forward.4
= control target key start
LH: loop header
LB: loop body
LE: loop exit
PB: predicated region body
PF: predicated region fallthrough
CT: control target
= control target key end

     0   :  { %s1804_s18 = smov 0   ;;  %s1806_s19 = smov 0   ;;  %s2397_s0 = inlined_call_operand.vmem [shape: f32[2,36,2048], index: 0, kind: input, shape index: {}]   ;;  %s2398_s1 = inlined_call_operand.vmem [shape: f32[2,4,36], index: 1, kind: input, shape index: {}]   ;;  %s2399_s2 = inlined_call_operand.vmem [shape: f32[2,4,1], index: 2, kind: input, shape index: {}]   ;;  %s2400_s3 = inlined_call_operand.vmem [shape: f32[2,4,1], index: 3, kind: input, shape index: {}]   ;;  %s2401_s4 = inlined_call_operand.vmem [shape: f32[2,4,1], index: 4, kind: input, shape index: {}]   ;;  %s2402_s5 = inlined_call_operand.vmem [shape: f32[2,4,2048], index: 5, kind: output, shape index: {}]  }
   0x1   :  { %s1808_s20 = smov 0   ;;  %s1810_s21 = smov 0  }
   0x2   :  { %s1812_s22 = smov 0   ;;  %s1814_s23 = smov 0  }
   0x3   :  { %s1816_s24 = smov 0   ;;  %s1818_s25 = smov 0  }
   0x4   :  { %s1820_s26 = smov 0  }
   0x5 LB: > { %s1521_s27 = sadd.s32 4294967295, %s1767_s26   ;;  %s24_s28 = sadd.s32 1, %s1759_s24  ;;  %s1767_s26 = sphi %s1820_s26, %s15_s26   ;;  %s1763_s25 = sphi %s1818_s25, %s2412_s25   ;;  %s1759_s24 = sphi %s1816_s24, %s2411_s24   ;;  %s1755_s23 = sphi %s1814_s23, %s2410_s23   ;;  %s1751_s22 = sphi %s1812_s22, %s2409_s22   ;;  %s1747_s21 = sphi %s1810_s21, %s2408_s21   ;;  %s1743_s20 = sphi %s1808_s20, %s2407_s20   ;;  %s1739_s19 = sphi %s1806_s19, %s2406_s19   ;;  %s1735_s18 = sphi %s1804_s18, %s2405_s18  }
   0x6   : > { %p25_p0 = scmp.ge.s32.totalorder %s24_s28, 2  ;;  %s27_s29 = sadd.s32 1, %s1763_s25 }
   0x7   : > { %s34_s30 = sadd.s32 1, %s1747_s21  ;;  %p41_p1 = scmp.ne.s32.totalorder %s1747_s21, %s1743_s20 }
   0x8   : > { %s2414_s28 = smov (%p25_p0, %s24_s28), 0  ;;  %s2416_s29 = smov (!%p25_p0, %s27_s29), %s1763_s25 }
   0x9   : > { %s31_s6 = ssub.s32 %s1759_s24, %s2414_s28  ;;  %p42_p2 = scmp.eq.s32.totalorder %s1767_s26, 0 }
   0xa   : > { %p29_p3 = scmp.ge.s32.totalorder %s2416_s29, 2  ;;  %p32_p4 = scmp.eq.s32.totalorder %s31_s6, 0 }
   0xb   : > { %p1861_p5 = por %p42_p2, %p41_p1  ;;  %s141_s8 = smul.u32 %s1759_s24, %s1763_s25 }
   0xc   : > { %s2418_s29 = smov (%p29_p3, %s2416_s29), 0  ;;  %p156_p6 = scmp.ne.s32.totalorder %s1739_s19, %s1735_s18 }
   0xd   : > { %s1870_s9 = scalar_select %p32_p4, %s1747_s21, %s34_s30  }
   0xe   : > { %s142_s10 = smul.u32 %s2418_s29, %s2414_s28  ;;  %p157_p7 = scmp.eq.s32.totalorder %s1521_s27, 3 }
   0xf   : > { %s146_s12 = sadd.s32 1, %s1739_s19  ;;  %p1524_p10 = scmp.ge.s32.totalorder %s1767_s26, 4 }
  0x10   : > { %s143_s11 = ssub.s32 %s141_s8, %s142_s10  ;;  %p1877_p9 = por %p157_p7, %p156_p6 }
  0x11   : > { %p144_p8 = scmp.eq.s32.totalorder %s143_s11, 0  ;;  %191 = sbr.rel (%p1524_p10) target bundleno = 67 (0x43), region = 32 }
  0x13   : > { %s1882_s14 = scalar_select %p144_p8, %s1739_s19, %s146_s12  }
  0x16   : > { %194 = sbr.rel (!%p1861_p5) target bundleno = 67 (0x43), region = 36  ;;  %s196_s15 = sand.u32 (%p1861_p5), 1, %s1747_s21  }
  0x17   : > { %s1608_s16 = sshll.u32 (%p1861_p5), %s1759_s24, 6  ;;  %s1610_s17 = smul.u32 (%p1861_p5), 640, %s196_s15 }
  0x18   : > { %s1892_s6 = scalar_lea.vmem (%p1861_p5), %s2397_s0, %s1608_s16 }
  0x19   : > { %v214_v0 = vld [vmem:[%s1892_s6] sm:$0xff] (%p1861_p5)  ;;  %v216_v1 = vld [vmem:[%s1892_s6 + $0x8] sm:$0xff] (%p1861_p5)  ;;  %v218_v2 = vld [vmem:[%s1892_s6 + $0x10] sm:$0xff] (%p1861_p5)  ;;  %s1900_s7 = scalar_lea.vmem (%p1861_p5), [#allocation6], %s1610_s17 }
  0x1a   : > { %v220_v3 = vld [vmem:[%s1892_s6 + $0x18] sm:$0xff] (%p1861_p5)  ;;  %v222_v4 = vld [vmem:[%s1892_s6 + $0x20] sm:$0xff] (%p1861_p5)  ;;  %v224_v5 = vld [vmem:[%s1892_s6 + $0x28] sm:$0xff] (%p1861_p5)  ;;  %215 = vst [vmem:[%s1900_s7] sm:$0xff] (%p1861_p5), %v214_v0 }
  0x1b   : > { %217 = vst [vmem:[%s1900_s7 + $0x8] sm:$0xff] %v216_v1  ;;  %219 = vst [vmem:[%s1900_s7 + $0x10] sm:$0xff] %v218_v2  ;;  %v226_v6 = vld [vmem:[%s1892_s6 + $0x30] sm:$0xff]  ;;  %v228_v7 = vld [vmem:[%s1892_s6 + $0x38] sm:$0xff] }
  0x1c   : > { %221 = vst [vmem:[%s1900_s7 + $0x18] sm:$0xff] %v220_v3  ;;  %223 = vst [vmem:[%s1900_s7 + $0x20] sm:$0xff] %v222_v4  ;;  %v230_v8 = vld [vmem:[%s1892_s6 + $0x80] sm:$0xff]  ;;  %v232_v9 = vld [vmem:[%s1892_s6 + $0x88] sm:$0xff] }
  0x1d   : > { %225 = vst [vmem:[%s1900_s7 + $0x28] sm:$0xff] %v224_v5  ;;  %227 = vst [vmem:[%s1900_s7 + $0x30] sm:$0xff] %v226_v6  ;;  %v234_v10 = vld [vmem:[%s1892_s6 + $0x90] sm:$0xff]  ;;  %v236_v11 = vld [vmem:[%s1892_s6 + $0x98] sm:$0xff] }
  0x1e   : > { %229 = vst [vmem:[%s1900_s7 + $0x38] sm:$0xff] %v228_v7  ;;  %231 = vst [vmem:[%s1900_s7 + $0x40] sm:$0xff] %v230_v8  ;;  %v238_v12 = vld [vmem:[%s1892_s6 + $0xa0] sm:$0xff]  ;;  %v240_v13 = vld [vmem:[%s1892_s6 + $0xa8] sm:$0xff] }
  0x1f   : > { %233 = vst [vmem:[%s1900_s7 + $0x48] sm:$0xff] %v232_v9  ;;  %235 = vst [vmem:[%s1900_s7 + $0x50] sm:$0xff] %v234_v10  ;;  %v242_v14 = vld [vmem:[%s1892_s6 + $0xb0] sm:$0xff]  ;;  %v244_v15 = vld [vmem:[%s1892_s6 + $0xb8] sm:$0xff] }
  0x20   : > { %237 = vst [vmem:[%s1900_s7 + $0x58] sm:$0xff] %v236_v11  ;;  %239 = vst [vmem:[%s1900_s7 + $0x60] sm:$0xff] %v238_v12  ;;  %v246_v16 = vld [vmem:[%s1892_s6 + $0x100] sm:$0xff]  ;;  %v248_v17 = vld [vmem:[%s1892_s6 + $0x108] sm:$0xff] }
  0x21   : > { %241 = vst [vmem:[%s1900_s7 + $0x68] sm:$0xff] %v240_v13  ;;  %243 = vst [vmem:[%s1900_s7 + $0x70] sm:$0xff] %v242_v14  ;;  %v250_v18 = vld [vmem:[%s1892_s6 + $0x110] sm:$0xff]  ;;  %v252_v19 = vld [vmem:[%s1892_s6 + $0x118] sm:$0xff] }
  0x22   : > { %245 = vst [vmem:[%s1900_s7 + $0x78] sm:$0xff] %v244_v15  ;;  %247 = vst [vmem:[%s1900_s7 + $0x80] sm:$0xff] %v246_v16  ;;  %v254_v20 = vld [vmem:[%s1892_s6 + $0x120] sm:$0xff]  ;;  %v256_v21 = vld [vmem:[%s1892_s6 + $0x128] sm:$0xff] }
  0x23   : > { %249 = vst [vmem:[%s1900_s7 + $0x88] sm:$0xff] %v248_v17  ;;  %251 = vst [vmem:[%s1900_s7 + $0x90] sm:$0xff] %v250_v18  ;;  %v258_v22 = vld [vmem:[%s1892_s6 + $0x130] sm:$0xff]  ;;  %v260_v23 = vld [vmem:[%s1892_s6 + $0x138] sm:$0xff] }
  0x24   : > { %253 = vst [vmem:[%s1900_s7 + $0x98] sm:$0xff] %v252_v19  ;;  %255 = vst [vmem:[%s1900_s7 + $0xa0] sm:$0xff] %v254_v20  ;;  %v262_v24 = vld [vmem:[%s1892_s6 + $0x180] sm:$0xff]  ;;  %v264_v25 = vld [vmem:[%s1892_s6 + $0x188] sm:$0xff] }
  0x25   : > { %257 = vst [vmem:[%s1900_s7 + $0xa8] sm:$0xff] %v256_v21  ;;  %259 = vst [vmem:[%s1900_s7 + $0xb0] sm:$0xff] %v258_v22  ;;  %v266_v26 = vld [vmem:[%s1892_s6 + $0x190] sm:$0xff]  ;;  %v268_v27 = vld [vmem:[%s1892_s6 + $0x198] sm:$0xff] }
  0x26   : > { %261 = vst [vmem:[%s1900_s7 + $0xb8] sm:$0xff] %v260_v23  ;;  %263 = vst [vmem:[%s1900_s7 + $0xc0] sm:$0xff] %v262_v24  ;;  %v270_v28 = vld [vmem:[%s1892_s6 + $0x1a0] sm:$0xff]  ;;  %v272_v29 = vld [vmem:[%s1892_s6 + $0x1a8] sm:$0xff] }
  0x27   : > { %265 = vst [vmem:[%s1900_s7 + $0xc8] sm:$0xff] %v264_v25  ;;  %267 = vst [vmem:[%s1900_s7 + $0xd0] sm:$0xff] %v266_v26  ;;  %v274_v30 = vld [vmem:[%s1892_s6 + $0x1b0] sm:$0xff]  ;;  %v276_v31 = vld [vmem:[%s1892_s6 + $0x1b8] sm:$0xff] }
  0x28   : > { %269 = vst [vmem:[%s1900_s7 + $0xd8] sm:$0xff] %v268_v27  ;;  %271 = vst [vmem:[%s1900_s7 + $0xe0] sm:$0xff] %v270_v28  ;;  %v278_v32 = vld [vmem:[%s1892_s6 + $0x200] sm:$0xff]  ;;  %v280_v33 = vld [vmem:[%s1892_s6 + $0x208] sm:$0xff] }
  0x29   : > { %273 = vst [vmem:[%s1900_s7 + $0xe8] sm:$0xff] %v272_v29  ;;  %275 = vst [vmem:[%s1900_s7 + $0xf0] sm:$0xff] %v274_v30  ;;  %v282_v34 = vld [vmem:[%s1892_s6 + $0x210] sm:$0xff]  ;;  %v284_v35 = vld [vmem:[%s1892_s6 + $0x218] sm:$0xff] }
  0x2a   : > { %277 = vst [vmem:[%s1900_s7 + $0xf8] sm:$0xff] %v276_v31  ;;  %279 = vst [vmem:[%s1900_s7 + $0x100] sm:$0xff] %v278_v32  ;;  %v286_v36 = vld [vmem:[%s1892_s6 + $0x220] sm:$0xff]  ;;  %v288_v37 = vld [vmem:[%s1892_s6 + $0x228] sm:$0xff] }
  0x2b   : > { %281 = vst [vmem:[%s1900_s7 + $0x108] sm:$0xff] %v280_v33  ;;  %283 = vst [vmem:[%s1900_s7 + $0x110] sm:$0xff] %v282_v34  ;;  %v290_v38 = vld [vmem:[%s1892_s6 + $0x230] sm:$0xff]  ;;  %v292_v39 = vld [vmem:[%s1892_s6 + $0x238] sm:$0xff] }
  0x2c   : > { %285 = vst [vmem:[%s1900_s7 + $0x118] sm:$0xff] %v284_v35  ;;  %287 = vst [vmem:[%s1900_s7 + $0x120] sm:$0xff] %v286_v36  ;;  %v294_v40 = vld [vmem:[%s1892_s6 + $0x280] sm:$0xff]  ;;  %v296_v41 = vld [vmem:[%s1892_s6 + $0x288] sm:$0xff] }
  0x2d   : > { %289 = vst [vmem:[%s1900_s7 + $0x128] sm:$0xff] %v288_v37  ;;  %291 = vst [vmem:[%s1900_s7 + $0x130] sm:$0xff] %v290_v38  ;;  %v298_v42 = vld [vmem:[%s1892_s6 + $0x290] sm:$0xff]  ;;  %v300_v43 = vld [vmem:[%s1892_s6 + $0x298] sm:$0xff] }
  0x2e   : > { %293 = vst [vmem:[%s1900_s7 + $0x138] sm:$0xff] %v292_v39  ;;  %295 = vst [vmem:[%s1900_s7 + $0x140] sm:$0xff] %v294_v40  ;;  %v302_v44 = vld [vmem:[%s1892_s6 + $0x2a0] sm:$0xff]  ;;  %v304_v45 = vld [vmem:[%s1892_s6 + $0x2a8] sm:$0xff] }
  0x2f   : > { %297 = vst [vmem:[%s1900_s7 + $0x148] sm:$0xff] %v296_v41  ;;  %299 = vst [vmem:[%s1900_s7 + $0x150] sm:$0xff] %v298_v42  ;;  %v306_v46 = vld [vmem:[%s1892_s6 + $0x2b0] sm:$0xff]  ;;  %v308_v47 = vld [vmem:[%s1892_s6 + $0x2b8] sm:$0xff] }
  0x30   : > { %301 = vst [vmem:[%s1900_s7 + $0x158] sm:$0xff] %v300_v43  ;;  %303 = vst [vmem:[%s1900_s7 + $0x160] sm:$0xff] %v302_v44  ;;  %v310_v48 = vld [vmem:[%s1892_s6 + $0x300] sm:$0xff]  ;;  %v312_v49 = vld [vmem:[%s1892_s6 + $0x308] sm:$0xff] }
  0x31   : > { %305 = vst [vmem:[%s1900_s7 + $0x168] sm:$0xff] %v304_v45  ;;  %307 = vst [vmem:[%s1900_s7 + $0x170] sm:$0xff] %v306_v46  ;;  %v314_v50 = vld [vmem:[%s1892_s6 + $0x310] sm:$0xff]  ;;  %v316_v51 = vld [vmem:[%s1892_s6 + $0x318] sm:$0xff] }
  0x32   : > { %309 = vst [vmem:[%s1900_s7 + $0x178] sm:$0xff] %v308_v47  ;;  %311 = vst [vmem:[%s1900_s7 + $0x180] sm:$0xff] %v310_v48  ;;  %v318_v52 = vld [vmem:[%s1892_s6 + $0x320] sm:$0xff]  ;;  %v320_v53 = vld [vmem:[%s1892_s6 + $0x328] sm:$0xff] }
  0x33   : > { %313 = vst [vmem:[%s1900_s7 + $0x188] sm:$0xff] %v312_v49  ;;  %315 = vst [vmem:[%s1900_s7 + $0x190] sm:$0xff] %v314_v50  ;;  %v322_v54 = vld [vmem:[%s1892_s6 + $0x330] sm:$0xff]  ;;  %v324_v55 = vld [vmem:[%s1892_s6 + $0x338] sm:$0xff] }
  0x34   : > { %317 = vst [vmem:[%s1900_s7 + $0x198] sm:$0xff] %v316_v51  ;;  %319 = vst [vmem:[%s1900_s7 + $0x1a0] sm:$0xff] %v318_v52  ;;  %v326_v56 = vld [vmem:[%s1892_s6 + $0x380] sm:$0xff]  ;;  %v328_v57 = vld [vmem:[%s1892_s6 + $0x388] sm:$0xff] }
  0x35   : > { %321 = vst [vmem:[%s1900_s7 + $0x1a8] sm:$0xff] %v320_v53  ;;  %323 = vst [vmem:[%s1900_s7 + $0x1b0] sm:$0xff] %v322_v54  ;;  %v330_v58 = vld [vmem:[%s1892_s6 + $0x390] sm:$0xff]  ;;  %v332_v59 = vld [vmem:[%s1892_s6 + $0x398] sm:$0xff] }
  0x36   : > { %325 = vst [vmem:[%s1900_s7 + $0x1b8] sm:$0xff] %v324_v55  ;;  %327 = vst [vmem:[%s1900_s7 + $0x1c0] sm:$0xff] %v326_v56  ;;  %v334_v60 = vld [vmem:[%s1892_s6 + $0x3a0] sm:$0xff]  ;;  %v336_v61 = vld [vmem:[%s1892_s6 + $0x3a8] sm:$0xff] }
  0x37   : > { %329 = vst [vmem:[%s1900_s7 + $0x1c8] sm:$0xff] %v328_v57  ;;  %331 = vst [vmem:[%s1900_s7 + $0x1d0] sm:$0xff] %v330_v58  ;;  %v338_v62 = vld [vmem:[%s1892_s6 + $0x3b0] sm:$0xff]  ;;  %v340_v63 = vld [vmem:[%s1892_s6 + $0x3b8] sm:$0xff] }
  0x38   : > { %333 = vst [vmem:[%s1900_s7 + $0x1d8] sm:$0xff] %v332_v59  ;;  %335 = vst [vmem:[%s1900_s7 + $0x1e0] sm:$0xff] %v334_v60  ;;  %v342_v0 = vld [vmem:[%s1892_s6 + $0x400] sm:$0xff]  ;;  %v344_v1 = vld [vmem:[%s1892_s6 + $0x408] sm:$0xff] }
  0x39   : > { %337 = vst [vmem:[%s1900_s7 + $0x1e8] sm:$0xff] %v336_v61  ;;  %339 = vst [vmem:[%s1900_s7 + $0x1f0] sm:$0xff] %v338_v62  ;;  %v346_v2 = vld [vmem:[%s1892_s6 + $0x410] sm:$0xff]  ;;  %v348_v3 = vld [vmem:[%s1892_s6 + $0x418] sm:$0xff] }
  0x3a   : > { %341 = vst [vmem:[%s1900_s7 + $0x1f8] sm:$0xff] %v340_v63  ;;  %343 = vst [vmem:[%s1900_s7 + $0x200] sm:$0xff] %v342_v0  ;;  %v350_v4 = vld [vmem:[%s1892_s6 + $0x420] sm:$0xff]  ;;  %v352_v5 = vld [vmem:[%s1892_s6 + $0x428] sm:$0xff] }
  0x3b   : > { %345 = vst [vmem:[%s1900_s7 + $0x208] sm:$0xff] %v344_v1  ;;  %347 = vst [vmem:[%s1900_s7 + $0x210] sm:$0xff] %v346_v2  ;;  %v354_v6 = vld [vmem:[%s1892_s6 + $0x430] sm:$0xff]  ;;  %v356_v7 = vld [vmem:[%s1892_s6 + $0x438] sm:$0xff] }
  0x3c   : > { %349 = vst [vmem:[%s1900_s7 + $0x218] sm:$0xff] %v348_v3  ;;  %351 = vst [vmem:[%s1900_s7 + $0x220] sm:$0xff] %v350_v4  ;;  %v358_v8 = vld [vmem:[%s1892_s6 + $0x480] sm:$0xff]  ;;  %v360_v9 = vld [vmem:[%s1892_s6 + $0x488] sm:$0xff] }
  0x3d   : > { %353 = vst [vmem:[%s1900_s7 + $0x228] sm:$0xff] %v352_v5  ;;  %355 = vst [vmem:[%s1900_s7 + $0x230] sm:$0xff] %v354_v6  ;;  %v362_v10 = vld [vmem:[%s1892_s6 + $0x490] sm:$0xff]  ;;  %v364_v11 = vld [vmem:[%s1892_s6 + $0x498] sm:$0xff] }
  0x3e   : > { %357 = vst [vmem:[%s1900_s7 + $0x238] sm:$0xff] %v356_v7  ;;  %359 = vst [vmem:[%s1900_s7 + $0x240] sm:$0xff] %v358_v8  ;;  %v366_v12 = vld [vmem:[%s1892_s6 + $0x4a0] sm:$0xff]  ;;  %v368_v13 = vld [vmem:[%s1892_s6 + $0x4a8] sm:$0xff] }
  0x3f   : > { %361 = vst [vmem:[%s1900_s7 + $0x248] sm:$0xff] %v360_v9  ;;  %363 = vst [vmem:[%s1900_s7 + $0x250] sm:$0xff] %v362_v10  ;;  %v370_v14 = vld [vmem:[%s1892_s6 + $0x4b0] sm:$0xff]  ;;  %v372_v15 = vld [vmem:[%s1892_s6 + $0x4b8] sm:$0xff] }
  0x40   : > { %365 = vst [vmem:[%s1900_s7 + $0x258] sm:$0xff] %v364_v11  ;;  %367 = vst [vmem:[%s1900_s7 + $0x260] sm:$0xff] %v366_v12 }
  0x41   : > { %369 = vst [vmem:[%s1900_s7 + $0x268] sm:$0xff] %v368_v13  ;;  %371 = vst [vmem:[%s1900_s7 + $0x270] sm:$0xff] %v370_v14 }
  0x42   : > { %373 = vst [vmem:[%s1900_s7 + $0x278] sm:$0xff] %v372_v15 }
  0x43 PF: > { %p1527_p11 = scmp.ge.s32.totalorder %s1767_s26, 1  ;;  %p378_p12 = scmp.lt.s32.totalorder %s1767_s26, 5 }
  0x45   : > { %p379_p13 = pnand %p1527_p11, %p378_p12 }
  0x46   : > { %s385_s8 = sand.u32 (!%p379_p13), 1, %s1743_s20   ;;  %s408_s10 = sand.u32 (!%p379_p13), 1, %s1735_s18  }
  0x47   : > { %382 = sbr.rel (%p379_p13) target bundleno = 1183 (0x49f), region = 59  ;;  %s1528_s12 = sshll.u32 (!%p379_p13), %s408_s10, 6 }
  0x48   : > { %s1611_s11 = smul.u32 (!%p379_p13), 640, %s385_s8  ;;  %p414_p0 = scmp.eq.s32.totalorder (!%p379_p13), %s1755_s23, 0 }
  0x49   : > { %p415_p1 = scmp.eq.s32.totalorder (!%p379_p13), %s1751_s22, 0  ;;  %s2066_s16 = scalar_lea.vmem (!%p379_p13), [#allocation7], %s1528_s12 }
  0x4a   : > { %s2064_s15 = scalar_lea.vmem (!%p379_p13), [#allocation6], %s1611_s11 }
  0x4b   : > { %p416_p2 = pnand (!%p379_p13), %p415_p1, %p414_p0 }
  0x4d   : > { %419 = sbr.rel (%p416_p2) target bundleno = 85 (0x55), region = 67 }
  0x52   : > { %vm420_vm0 = vcmask 3072   ;;  %v1769_v16 = vmov 0.0  }
  0x53   : > { %421 = vst.msk [vmem:[#allocation2] sm:$0xf] %vm420_vm0, %v1769_v16  ;;  %422 = vst.msk [vmem:[#allocation2 + $0x4] sm:$0xf] %vm420_vm0, %v1769_v16 }
  0x54   : > { %423 = vst.msk [vmem:[#allocation3] sm:$0xf] %vm420_vm0, %v1769_v16  ;;  %424 = vst.msk [vmem:[#allocation3 + $0x4] sm:$0xf] %vm420_vm0, %v1769_v16 }
  0x55 PF: > { %p425_p3 = scmp.eq.s32.totalorder %s1755_s23, 1 }
  0x57   : > { %p426_p4 = pnand %p425_p3, %p415_p1 }
  0x59   : > { %429 = sbr.rel (%p426_p4) target bundleno = 127 (0x7f), region = 71 }
  0x5e   : > { %v430_v17 = vld [vmem:[#allocation2] sm:$0xf]  ;;  %v434_v18 = vld [vmem:[#allocation3] sm:$0xf]  ;;  %v431_v21 = vld [vmem:[#allocation2 + $0x4] sm:$0xf] }
  0x5f   : > { %v432_v19 = vmul.f32 0.00048828125, %v430_v17  ;;  %v436_v20 = vmul.f32 0.00048828125, %v434_v18  ;;  %v433_v22 = vmul.f32 0.00048828125, %v431_v21  ;;  %v435_v23 = vld [vmem:[#allocation3 + $0x4] sm:$0xf]  ;;  %vm452_vm1 = vcmask 3072  }
  0x60   : > { %v437_v25 = vmul.f32 0.00048828125, %v435_v23  ;;  %v444_v33 = vld [vmem:[%s2400_s3] sm:$0xf]  ;;  %v445_v34 = vld [vmem:[%s2400_s3 + $0x4] sm:$0xf] }
  0x61   : > { %v438_v24 = vmul.f32 %v432_v19, %v432_v19  ;;  %v439_v26 = vmul.f32 %v433_v22, %v433_v22  ;;  %v455_v39 = vld [vmem:[%s2401_s4] sm:$0xf]  ;;  %v456_v41 = vld [vmem:[%s2401_s4 + $0x4] sm:$0xf] }
  0x63   : > { %v440_v27 = vsub.f32 %v436_v20, %v438_v24  ;;  %v441_v28 = vsub.f32 %v437_v25, %v439_v26 }
  0x65   : > { %v442_v29 = vmax.f32 %v440_v27, 0.0  ;;  %v443_v30 = vmax.f32 %v441_v28, 0.0 }
  0x67   : > { %v446_v31 = vadd.f32 1e-05, %v442_v29  ;;  %v447_v32 = vadd.f32 1e-05, %v443_v30 }
  0x69   : > { %1689 = vrsqrt.f32 %v446_v31 }
  0x6a   : > { %1691 = vrsqrt.f32 %v447_v32 }
  0x76   : > { %v1690_v35 = vpop.eup %1689 }
  0x77   : > { %v1692_v36 = vpop.eup %1691  ;;  %v450_v37 = vmul.f32 %v1690_v35, %v444_v33 }
  0x78   : > { %v451_v38 = vmul.f32 %v1692_v36, %v445_v34 }
  0x79   : > { %453 = vst.msk [vmem:[#allocation4] sm:$0xf] %vm452_vm1, %v450_v37  ;;  %v457_v40 = vmul.f32 %v450_v37, %v432_v19 }
  0x7a   : > { %454 = vst.msk [vmem:[#allocation4 + $0x4] sm:$0xf] %vm452_vm1, %v451_v38  ;;  %v458_v42 = vmul.f32 %v451_v38, %v433_v22 }
  0x7b   : > { %v459_v43 = vsub.f32 %v455_v39, %v457_v40 }
  0x7c   : > { %v460_v44 = vsub.f32 %v456_v41, %v458_v42 }
  0x7d   : > { %461 = vst.msk [vmem:[#allocation5] sm:$0xf] %vm452_vm1, %v459_v43 }
  0x7e   : > { %462 = vst.msk [vmem:[#allocation5 + $0x4] sm:$0xf] %vm452_vm1, %v460_v44 }
  0x7f PF: > { %v497_v45 = vld [vmem:[%s2064_s15 + $0x108] sm:$0xf]  ;;  %vm514_vm2 = vcmask 1043456   ;;  %v499_v46 = vld [vmem:[%s2064_s15 + $0x118] sm:$0xf]  ;;  %v488_v51 = vld [vmem:[%s2064_s15 + $0xc0] sm:$0xff] }
  0x80   : > { %v489_v47 = vld [vmem:[%s2064_s15 + $0xc8] sm:$0xff]  ;;  %1529 = vmatprep.subr.msk.mxu0 %vm514_vm2, %v497_v45  ;;  %1532 = vmatprep.subr.msk.mxu1 %vm514_vm2, %v499_v46  ;;  %v496_v48 = vld [vmem:[%s2064_s15 + $0x100] sm:$0xf]  ;;  %v498_v49 = vld [vmem:[%s2064_s15 + $0x110] sm:$0xf]  ;;  %vm510_vm3 = vcmask 293888  }
  0x81   : > { %v491_v50 = vld [vmem:[%s2064_s15 + $0xd8] sm:$0xff]  ;;  %1530 = vmatpush1.msk.msra.mxu0 %vm514_vm2, %v496_v48  ;;  %1533 = vmatpush1.msk.msra.mxu1 %vm514_vm2, %v498_v49  ;;  %v490_v52 = vld [vmem:[%s2064_s15 + $0xd0] sm:$0xff]  ;;  %v481_v53 = vld [vmem:[%s2064_s15 + $0x88] sm:$0xff]  ;;  %v1770_v2 = vmov 0.0   ;;  %v1771_v24 = vmov 0   ;;  %p1541_p5 = scmp.ne.s32.totalorder %s1755_s23, 0 }
  0x82   : > { %563 = vmatprep.subr.mxu0 %v489_v47  ;;  %634 = vmatprep.subr.mxu1 %v491_v50  ;;  %v483_v54 = vld [vmem:[%s2064_s15 + $0x98] sm:$0xff]  ;;  %v480_v55 = vld [vmem:[%s2064_s15 + $0x80] sm:$0xff]  ;;  %v482_v56 = vld [vmem:[%s2064_s15 + $0x90] sm:$0xff] }
  0x83   : > { %564 = vmatpush1.msra.mxu0 %v488_v51  ;;  %635 = vmatpush1.msra.mxu1 %v490_v52  ;;  %v473_v57 = vld [vmem:[%s2064_s15 + $0x48] sm:$0xff]  ;;  %v475_v58 = vld [vmem:[%s2064_s15 + $0x58] sm:$0xff]  ;;  %v472_v59 = vld [vmem:[%s2064_s15 + $0x40] sm:$0xff] }
  0x84   : > { %565 = vmatprep.subr.mxu0 %v481_v53  ;;  %636 = vmatprep.subr.mxu1 %v483_v54  ;;  %v474_v60 = vld [vmem:[%s2064_s15 + $0x50] sm:$0xff]  ;;  %v465_v61 = vld [vmem:[%s2064_s15 + $0x8] sm:$0xff]  ;;  %v467_v62 = vld [vmem:[%s2064_s15 + $0x18] sm:$0xff] }
  0x85   : > { %566 = vmatpush1.msra.mxu0 %v480_v55  ;;  %637 = vmatpush1.msra.mxu1 %v482_v56  ;;  %v464_v63 = vld [vmem:[%s2064_s15] sm:$0xff]  ;;  %v466_v0 = vld [vmem:[%s2064_s15 + $0x10] sm:$0xff]  ;;  %v501_v3 = vld [vmem:[%s2064_s15 + $0x128] sm:$0xf] }
  0x86   : > { %567 = vmatprep.subr.mxu0 %v473_v57  ;;  %638 = vmatprep.subr.mxu1 %v475_v58  ;;  %v463_v1 = vld [vmem:[%s2398_s1] sm:$0xf]  ;;  %v503_v4 = vld [vmem:[%s2064_s15 + $0x138] sm:$0xf]  ;;  %v502_v6 = vld [vmem:[%s2064_s15 + $0x130] sm:$0xf] }
  0x87   : > { %568 = vmatpush1.msra.mxu0 %v472_v59  ;;  %639 = vmatpush1.msra.mxu1 %v474_v60  ;;  %v500_v5 = vld [vmem:[%s2064_s15 + $0x120] sm:$0xf]  ;;  %v493_v7 = vld [vmem:[%s2064_s15 + $0xe8] sm:$0xff]  ;;  %v495_v8 = vld [vmem:[%s2064_s15 + $0xf8] sm:$0xff] }
  0x88   : > { %569 = vmatprep.subr.mxu0 %v465_v61  ;;  %640 = vmatprep.subr.mxu1 %v467_v62  ;;  %v492_v9 = vld [vmem:[%s2064_s15 + $0xe0] sm:$0xff]  ;;  %v494_v10 = vld [vmem:[%s2064_s15 + $0xf0] sm:$0xff]  ;;  %v485_v11 = vld [vmem:[%s2064_s15 + $0xa8] sm:$0xff] }
  0x89   : > { %570 = vmatpush1.msra.mxu0 %v464_v63  ;;  %603 = vmatprep.mubr.f32.mxu0 %v1770_v2  ;;  %v487_v12 = vld [vmem:[%s2064_s15 + $0xb8] sm:$0xff]  ;;  %v484_v13 = vld [vmem:[%s2064_s15 + $0xa0] sm:$0xff]  ;;  %v486_v14 = vld [vmem:[%s2064_s15 + $0xb0] sm:$0xff] }
  0x8a   : > { %641 = vmatpush1.msra.mxu1 %v466_v0  ;;  %674 = vmatprep.mubr.f32.mxu1 %v1770_v2  ;;  %v477_v15 = vld [vmem:[%s2064_s15 + $0x68] sm:$0xff]  ;;  %v479_v16 = vld [vmem:[%s2064_s15 + $0x78] sm:$0xff]  ;;  %v476_v17 = vld [vmem:[%s2064_s15 + $0x60] sm:$0xff] }
  0x8b   : > { %1531 = vmatmul.mubr.msk.f32.vlgmr.msra.gmra.mxu0 %vm510_vm3, %v463_v1  ;;  %1534 = vmatmul.mubr.msk.f32.vlgmr.msra.gmra.mxu1 %vm510_vm3, %v463_v1  ;;  %v478_v18 = vld [vmem:[%s2064_s15 + $0x70] sm:$0xff]  ;;  %v469_v19 = vld [vmem:[%s2064_s15 + $0x28] sm:$0xff]  ;;  %v471_v20 = vld [vmem:[%s2064_s15 + $0x38] sm:$0xff] }
  0x8c   : > { %1535 = vmatprep.subr.msk.mxu0 %vm514_vm2, %v501_v3  ;;  %1538 = vmatprep.subr.msk.mxu1 %vm514_vm2, %v503_v4  ;;  %v468_v21 = vld [vmem:[%s2064_s15 + $0x20] sm:$0xff]  ;;  %v470_v22 = vld [vmem:[%s2064_s15 + $0x30] sm:$0xff] }
  0x8d   : > { %1536 = vmatpush1.msk.msra.mxu0 %vm514_vm2, %v500_v5  ;;  %1539 = vmatpush1.msk.msra.mxu1 %vm514_vm2, %v502_v6  ;;  %v504_v23 = vld [vmem:[%s2399_s2] sm:$0xf] }
  0x8e   : > { %705 = vmatprep.subr.mxu0 %v493_v7  ;;  %776 = vmatprep.subr.mxu1 %v495_v8 }
  0x8f   : > { %706 = vmatpush1.msra.mxu0 %v492_v9  ;;  %777 = vmatpush1.msra.mxu1 %v494_v10 }
  0x90   : > { %707 = vmatprep.subr.mxu0 %v485_v11  ;;  %778 = vmatprep.subr.mxu1 %v487_v12 }
  0x91   : > { %708 = vmatpush1.msra.mxu0 %v484_v13  ;;  %779 = vmatpush1.msra.mxu1 %v486_v14 }
  0x92   : > { %709 = vmatprep.subr.mxu0 %v477_v15  ;;  %780 = vmatprep.subr.mxu1 %v479_v16 }
  0x93   : > { %710 = vmatpush1.msra.mxu0 %v476_v17  ;;  %781 = vmatpush1.msra.mxu1 %v478_v18 }
  0x94   : > { %711 = vmatprep.subr.mxu0 %v469_v19  ;;  %782 = vmatprep.subr.mxu1 %v471_v20 }
  0x95   : > { %712 = vmatpush1.msra.mxu0 %v468_v21  ;;  %745 = vmatprep.mubr.f32.mxu0 %v1770_v2 }
  0x96   : > { %783 = vmatpush1.msra.mxu1 %v470_v22  ;;  %816 = vmatprep.mubr.f32.mxu1 %v1770_v2 }
  0x97   : > { %1537 = vmatmul.mubr.msk.f32.vlgmr.msra.gmra.mxu0 %vm510_vm3, %v463_v1  ;;  %1540 = vmatmul.mubr.msk.f32.vlgmr.msra.gmra.mxu1 %vm510_vm3, %v463_v1 }
  0x98   : > { %1693 = vset.pattern.permute.xlu0 %v1771_v24 }
  0x99   : > { %507 = vperm.xlu0 %1693, %v504_v23  }
 0x114   : > { %v508_v25 = vpop.permute.xlu0 %507 }
 0x14b   : > { %v605_v26 = vpop.f32.mrf.mxu0  ;;  %v676_v27 = vpop.f32.mrf.mxu1 }
 0x14c   : > { %v2146_v28 = vadd.f32 %v605_v26, %v508_v25  ;;  %v2148_v29 = vadd.f32 %v676_v27, %v508_v25 }
 0x14d   : > { %v607_v30 = vpop.f32.mrf.mxu0  ;;  %v678_v31 = vpop.f32.mrf.mxu1 }
 0x14e   : > { %v2150_v32 = vadd.f32 %v607_v30, %v508_v25  ;;  %v2152_v33 = vadd.f32 %v678_v31, %v508_v25 }
 0x156   : > { %825 = sbr.rel (%p1541_p5) target bundleno = 507 (0x1fb), region = 75 }
 0x157   : > { %v747_v34 = vpop.f32.mrf.mxu0  ;;  %v818_v35 = vpop.f32.mrf.mxu1 }
 0x158   : > { %v2154_v36 = vadd.f32 %v747_v34, %v508_v25  ;;  %v2156_v37 = vadd.f32 %v818_v35, %v508_v25 }
 0x159   : > { %v749_v38 = vpop.f32.mrf.mxu0  ;;  %v820_v39 = vpop.f32.mrf.mxu1 }
 0x15a   : > { %v2158_v40 = vadd.f32 %v749_v38, %v508_v25  ;;  %v2160_v41 = vadd.f32 %v820_v39, %v508_v25 }
 0x15b   : > { %v827_v42 = vsel %vm514_vm2, %v2146_v28, 0.0  ;;  %v828_v43 = vsel %vm514_vm2, %v2150_v32, 0.0  ;;  %v830_v44 = vsel %vm514_vm2, %v2148_v29, 0.0  ;;  %v832_v46 = vsel %vm514_vm2, %v2152_v33, 0.0  ;;  %v826_v17 = vld [vmem:[#allocation2] sm:$0xf] }
 0x15c   : > { %v829_v45 = vadd.f32 %v828_v43, %v827_v42  ;;  %v848_v47 = vmul.f32 %v2146_v28, %v2146_v28  ;;  %v849_v48 = vmul.f32 %v2150_v32, %v2150_v32  ;;  %v850_v49 = vmul.f32 %v2148_v29, %v2148_v29  ;;  %v847_v20 = vld [vmem:[#allocation3] sm:$0xf] }
 0x15d   : > { %v851_v51 = vmul.f32 %v2152_v33, %v2152_v33  ;;  %v834_v52 = vsel %vm514_vm2, %v2154_v36, 0.0  ;;  %v852_v53 = vmul.f32 %v2154_v36, %v2154_v36  ;;  %v836_v59 = vsel %vm514_vm2, %v2158_v40, 0.0 }
 0x15e   : > { %v831_v50 = vadd.f32 %v830_v44, %v829_v45  ;;  %v856_v54 = vsel %vm514_vm2, %v848_v47, 0.0  ;;  %v857_v55 = vsel %vm514_vm2, %v849_v48, 0.0  ;;  %v859_v58 = vsel %vm514_vm2, %v850_v49, 0.0 }
 0x15f   : > { %v858_v57 = vadd.f32 %v857_v55, %v856_v54  ;;  %v853_v60 = vmul.f32 %v2158_v40, %v2158_v40  ;;  %v861_v61 = vsel %vm514_vm2, %v851_v51, 0.0  ;;  %v838_v0 = vsel %vm514_vm2, %v2156_v37, 0.0 }
 0x160   : > { %v833_v56 = vadd.f32 %v832_v46, %v831_v50  ;;  %v854_v1 = vmul.f32 %v2156_v37, %v2156_v37  ;;  %v863_v3 = vsel %vm514_vm2, %v852_v53, 0.0  ;;  %v840_v6 = vsel %vm514_vm2, %v2160_v41, 0.0 }
 0x161   : > { %v860_v63 = vadd.f32 %v859_v58, %v858_v57  ;;  %v855_v7 = vmul.f32 %v2160_v41, %v2160_v41  ;;  %v865_v8 = vsel %vm514_vm2, %v853_v60, 0.0  ;;  %vm845_vm4 = vcmask 3072  }
 0x162   : > { %v835_v62 = vadd.f32 %v834_v52, %v833_v56  ;;  %v867_v11 = vsel %vm514_vm2, %v854_v1, 0.0 }
 0x163   : > { %v862_v5 = vadd.f32 %v861_v61, %v860_v63  ;;  %v869_v14 = vsel %vm514_vm2, %v855_v7, 0.0 }
 0x164   : > { %v837_v4 = vadd.f32 %v836_v59, %v835_v62 }
 0x165   : > { %v864_v10 = vadd.f32 %v863_v3, %v862_v5 }
 0x166   : > { %v839_v9 = vadd.f32 %v838_v0, %v837_v4 }
 0x167   : > { %v866_v13 = vadd.f32 %v865_v8, %v864_v10 }
 0x168   : > { %v841_v12 = vadd.f32 %v840_v6, %v839_v9 }
 0x169   : > { %v868_v15 = vadd.f32 %v867_v11, %v866_v13 }
 0x16a   : > { %842 = vadd.xlane.f32.xlu0 %v841_v12 }
 0x16b   : > { %v870_v16 = vadd.f32 %v869_v14, %v868_v15 }
 0x16e   : > { %871 = vadd.xlane.f32.xlu0 %v870_v16 }
 0x1f3   : > { %v843_v18 = vpop.xlane.xlu0 %842 }
 0x1f4   : > { %v844_v19 = vadd.f32 %v843_v18, %v826_v17 }
 0x1f6   : > { %846 = vst.msk [vmem:[#allocation2] sm:$0xf] %vm845_vm4, %v844_v19 }
 0x1f7   : > { %v872_v21 = vpop.xlane.xlu0 %871 }
 0x1f8   : > { %v873_v22 = vadd.f32 %v872_v21, %v847_v20 }
 0x1fa   : > { %874 = vst.msk [vmem:[#allocation3] sm:$0xf] %vm845_vm4, %v873_v22 }
 0x1fb PF: > { %p1542_p6 = scmp.ne.s32.totalorder %s1755_s23, 1 }
 0x1fd   : > { %877 = sbr.rel (%p1542_p6) target bundleno = 652 (0x28c), region = 79 }
 0x202   : > { %v878_v23 = vld [vmem:[#allocation4] sm:$0xf]  ;;  %v1772_v25 = vmov 0   ;;  %v892_v26 = vld [vmem:[#allocation5] sm:$0xf] }
 0x203   : > { %1694 = vset.pattern.permute.xlu0 %v1772_v25 }
 0x204   : > { %881 = vperm.xlu0 %1694, %v878_v23  }
 0x208   : > { %895 = vperm.xlu0 %1694, %v892_v26  }
 0x27f   : > { %v882_v27 = vpop.permute.xlu0 %881 }
 0x280   : > { %v884_v30 = vmul.f32 %v882_v27, %v2146_v28  ;;  %v885_v31 = vmul.f32 %v882_v27, %v2150_v32  ;;  %v886_v34 = vmul.f32 %v882_v27, %v2148_v29  ;;  %v887_v35 = vmul.f32 %v882_v27, %v2152_v33 }
 0x281   : > { %v888_v38 = vmul.f32 %v882_v27, %v2154_v36  ;;  %v889_v39 = vmul.f32 %v882_v27, %v2158_v40  ;;  %v890_v42 = vmul.f32 %v882_v27, %v2156_v37  ;;  %v891_v43 = vmul.f32 %v882_v27, %v2160_v41 }
 0x283   : > { %v896_v44 = vpop.permute.xlu0 %895 }
 0x284   : > { %v898_v45 = vadd.f32 %v896_v44, %v884_v30  ;;  %v899_v46 = vadd.f32 %v896_v44, %v885_v31  ;;  %v900_v47 = vadd.f32 %v896_v44, %v886_v34  ;;  %v901_v48 = vadd.f32 %v896_v44, %v887_v35 }
 0x285   : > { %v902_v28 = vadd.f32 %v896_v44, %v888_v38  ;;  %v903_v32 = vadd.f32 %v896_v44, %v889_v39  ;;  %v904_v29 = vadd.f32 %v896_v44, %v890_v42  ;;  %v905_v33 = vadd.f32 %v896_v44, %v891_v43 }
 0x286   : > { %v906_v36 = vmax.f32 %v898_v45, 0.0  ;;  %v907_v49 = vmax.f32 %v899_v46, 0.0  ;;  %v908_v40 = vmax.f32 %v900_v47, 0.0  ;;  %v909_v50 = vmax.f32 %v901_v48, 0.0 }
 0x287   : > { %v910_v37 = vmax.f32 %v902_v28, 0.0  ;;  %v911_v51 = vmax.f32 %v903_v32, 0.0  ;;  %v912_v41 = vmax.f32 %v904_v29, 0.0  ;;  %v913_v52 = vmax.f32 %v905_v33, 0.0 }
 0x288   : > { %v922_v53 = vcombine.low %v906_v36, %v907_v49  ;;  %v923_v54 = vcombine.low %v908_v40, %v909_v50 }
 0x289   : > { %v924_v55 = vcombine.low %v910_v37, %v911_v51  ;;  %v925_v56 = vcombine.low %v912_v41, %v913_v52 }
 0x28a   : > { %930 = vst [vmem:[%s2066_s16] sm:$0xff] %v922_v53  ;;  %931 = vst [vmem:[%s2066_s16 + $0x8] sm:$0xff] %v923_v54 }
 0x28b   : > { %932 = vst [vmem:[%s2066_s16 + $0x10] sm:$0xff] %v924_v55  ;;  %933 = vst [vmem:[%s2066_s16 + $0x18] sm:$0xff] %v925_v56 }
 0x28c PF: > { %v1577_v57 = vld [vmem:[%s2064_s15 + $0x248] sm:$0xf]  ;;  %v1579_v58 = vld [vmem:[%s2064_s15 + $0x258] sm:$0xf]  ;;  %v1576_v59 = vld [vmem:[%s2064_s15 + $0x240] sm:$0xf]  ;;  %1075 = vmatprep.mubr.f32.mxu0 %v1770_v2  ;;  %1146 = vmatprep.mubr.f32.mxu1 %v1770_v2 }
 0x28d   : > { %1585 = vmatprep.subr.msk.mxu0 %vm514_vm2, %v1577_v57  ;;  %1588 = vmatprep.subr.msk.mxu1 %vm514_vm2, %v1579_v58  ;;  %v1578_v60 = vld [vmem:[%s2064_s15 + $0x250] sm:$0xf]  ;;  %v1569_v61 = vld [vmem:[%s2064_s15 + $0x208] sm:$0xff]  ;;  %v1571_v62 = vld [vmem:[%s2064_s15 + $0x218] sm:$0xff] }
 0x28e   : > { %1586 = vmatpush1.msk.msra.mxu0 %vm514_vm2, %v1576_v59  ;;  %1589 = vmatpush1.msk.msra.mxu1 %vm514_vm2, %v1578_v60  ;;  %v1568_v63 = vld [vmem:[%s2064_s15 + $0x200] sm:$0xff]  ;;  %v1570_v0 = vld [vmem:[%s2064_s15 + $0x210] sm:$0xff]  ;;  %v1561_v1 = vld [vmem:[%s2064_s15 + $0x1c8] sm:$0xff] }
 0x28f   : > { %1035 = vmatprep.subr.mxu0 %v1569_v61  ;;  %1106 = vmatprep.subr.mxu1 %v1571_v62  ;;  %v1563_v3 = vld [vmem:[%s2064_s15 + $0x1d8] sm:$0xff]  ;;  %v1560_v4 = vld [vmem:[%s2064_s15 + $0x1c0] sm:$0xff]  ;;  %v1562_v5 = vld [vmem:[%s2064_s15 + $0x1d0] sm:$0xff] }
 0x290   : > { %1036 = vmatpush1.msra.mxu0 %v1568_v63  ;;  %1107 = vmatpush1.msra.mxu1 %v1570_v0  ;;  %v1553_v6 = vld [vmem:[%s2064_s15 + $0x188] sm:$0xff]  ;;  %v1555_v7 = vld [vmem:[%s2064_s15 + $0x198] sm:$0xff]  ;;  %v1552_v8 = vld [vmem:[%s2064_s15 + $0x180] sm:$0xff] }
 0x291   : > { %1037 = vmatprep.subr.mxu0 %v1561_v1  ;;  %1108 = vmatprep.subr.mxu1 %v1563_v3  ;;  %v1554_v9 = vld [vmem:[%s2064_s15 + $0x190] sm:$0xff]  ;;  %v1545_v10 = vld [vmem:[%s2064_s15 + $0x148] sm:$0xff]  ;;  %v1547_v11 = vld [vmem:[%s2064_s15 + $0x158] sm:$0xff] }
 0x292   : > { %1038 = vmatpush1.msra.mxu0 %v1560_v4  ;;  %1109 = vmatpush1.msra.mxu1 %v1562_v5  ;;  %v1544_v12 = vld [vmem:[%s2064_s15 + $0x140] sm:$0xff]  ;;  %v1546_v13 = vld [vmem:[%s2064_s15 + $0x150] sm:$0xff]  ;;  %v1581_v15 = vld [vmem:[%s2064_s15 + $0x268] sm:$0xf] }
 0x293   : > { %1039 = vmatprep.subr.mxu0 %v1553_v6  ;;  %1110 = vmatprep.subr.mxu1 %v1555_v7  ;;  %v1543_v14 = vld [vmem:[%s2398_s1 + $0x4] sm:$0xf]  ;;  %v1583_v16 = vld [vmem:[%s2064_s15 + $0x278] sm:$0xf]  ;;  %v1580_v17 = vld [vmem:[%s2064_s15 + $0x260] sm:$0xf] }
 0x294   : > { %1040 = vmatpush1.msra.mxu0 %v1552_v8  ;;  %1111 = vmatpush1.msra.mxu1 %v1554_v9  ;;  %v1582_v18 = vld [vmem:[%s2064_s15 + $0x270] sm:$0xf]  ;;  %v1573_v19 = vld [vmem:[%s2064_s15 + $0x228] sm:$0xff]  ;;  %v1575_v20 = vld [vmem:[%s2064_s15 + $0x238] sm:$0xff] }
 0x295   : > { %1041 = vmatprep.subr.mxu0 %v1545_v10  ;;  %1112 = vmatprep.subr.mxu1 %v1547_v11  ;;  %v1572_v21 = vld [vmem:[%s2064_s15 + $0x220] sm:$0xff]  ;;  %v1574_v22 = vld [vmem:[%s2064_s15 + $0x230] sm:$0xff]  ;;  %v1565_v23 = vld [vmem:[%s2064_s15 + $0x1e8] sm:$0xff] }
 0x296   : > { %1042 = vmatpush1.msra.mxu0 %v1544_v12  ;;  %1113 = vmatpush1.msra.mxu1 %v1546_v13  ;;  %v1567_v25 = vld [vmem:[%s2064_s15 + $0x1f8] sm:$0xff]  ;;  %v1564_v26 = vld [vmem:[%s2064_s15 + $0x1e0] sm:$0xff]  ;;  %v1566_v27 = vld [vmem:[%s2064_s15 + $0x1f0] sm:$0xff] }
 0x297   : > { %1587 = vmatmul.mubr.msk.f32.vlgmr.msra.gmra.mxu0 %vm510_vm3, %v1543_v14  ;;  %1590 = vmatmul.mubr.msk.f32.vlgmr.msra.gmra.mxu1 %vm510_vm3, %v1543_v14  ;;  %v1557_v30 = vld [vmem:[%s2064_s15 + $0x1a8] sm:$0xff]  ;;  %v1559_v31 = vld [vmem:[%s2064_s15 + $0x1b8] sm:$0xff]  ;;  %v1556_v34 = vld [vmem:[%s2064_s15 + $0x1a0] sm:$0xff] }
 0x298   : > { %1591 = vmatprep.subr.msk.mxu0 %vm514_vm2, %v1581_v15  ;;  %1594 = vmatprep.subr.msk.mxu1 %vm514_vm2, %v1583_v16  ;;  %v1558_v35 = vld [vmem:[%s2064_s15 + $0x1b0] sm:$0xff]  ;;  %v1549_v38 = vld [vmem:[%s2064_s15 + $0x168] sm:$0xff]  ;;  %v1551_v39 = vld [vmem:[%s2064_s15 + $0x178] sm:$0xff] }
 0x299   : > { %1592 = vmatpush1.msk.msra.mxu0 %vm514_vm2, %v1580_v17  ;;  %1595 = vmatpush1.msk.msra.mxu1 %vm514_vm2, %v1582_v18  ;;  %v1548_v42 = vld [vmem:[%s2064_s15 + $0x160] sm:$0xff]  ;;  %v1550_v43 = vld [vmem:[%s2064_s15 + $0x170] sm:$0xff] }
 0x29a   : > { %1177 = vmatprep.subr.mxu0 %v1573_v19  ;;  %1248 = vmatprep.subr.mxu1 %v1575_v20  ;;  %v1584_v44 = vld [vmem:[%s2399_s2 + $0x4] sm:$0xf] }
 0x29b   : > { %1178 = vmatpush1.msra.mxu0 %v1572_v21  ;;  %1249 = vmatpush1.msra.mxu1 %v1574_v22 }
 0x29c   : > { %1179 = vmatprep.subr.mxu0 %v1565_v23  ;;  %1250 = vmatprep.subr.mxu1 %v1567_v25 }
 0x29d   : > { %1180 = vmatpush1.msra.mxu0 %v1564_v26  ;;  %1251 = vmatpush1.msra.mxu1 %v1566_v27 }
 0x29e   : > { %1181 = vmatprep.subr.mxu0 %v1557_v30  ;;  %1252 = vmatprep.subr.mxu1 %v1559_v31 }
 0x29f   : > { %1182 = vmatpush1.msra.mxu0 %v1556_v34  ;;  %1253 = vmatpush1.msra.mxu1 %v1558_v35 }
 0x2a0   : > { %1183 = vmatprep.subr.mxu0 %v1549_v38  ;;  %1254 = vmatprep.subr.mxu1 %v1551_v39 }
 0x2a1   : > { %1184 = vmatpush1.msra.mxu0 %v1548_v42  ;;  %1217 = vmatprep.mubr.f32.mxu0 %v1770_v2 }
 0x2a2   : > { %1255 = vmatpush1.msra.mxu1 %v1550_v43  ;;  %1288 = vmatprep.mubr.f32.mxu1 %v1770_v2 }
 0x2a3   : > { %1593 = vmatmul.mubr.msk.f32.vlgmr.msra.gmra.mxu0 %vm510_vm3, %v1543_v14  ;;  %1596 = vmatmul.mubr.msk.f32.vlgmr.msra.gmra.mxu1 %vm510_vm3, %v1543_v14 }
 0x2a4   : > { %1695 = vset.pattern.permute.xlu0 %v1771_v24 }
 0x2a5   : > { %981 = vperm.xlu0 %1695, %v1584_v44  }
 0x320   : > { %v982_v45 = vpop.permute.xlu0 %981 }
 0x357   : > { %v1077_v46 = vpop.f32.mrf.mxu0  ;;  %v1148_v47 = vpop.f32.mrf.mxu1 }
 0x358   : > { %v2283_v48 = vadd.f32 %v1077_v46, %v982_v45  ;;  %v2285_v28 = vadd.f32 %v1148_v47, %v982_v45 }
 0x359   : > { %v1079_v32 = vpop.f32.mrf.mxu0  ;;  %v1150_v2 = vpop.f32.mrf.mxu1 }
 0x35a   : > { %v2287_v29 = vadd.f32 %v1079_v32, %v982_v45  ;;  %v2289_v33 = vadd.f32 %v1150_v2, %v982_v45 }
 0x362   : > { %1297 = sbr.rel (%p1541_p5) target bundleno = 1031 (0x407), region = 83 }
 0x363   : > { %v1219_v36 = vpop.f32.mrf.mxu0  ;;  %v1290_v49 = vpop.f32.mrf.mxu1 }
 0x364   : > { %v2291_v40 = vadd.f32 %v1219_v36, %v982_v45  ;;  %v2293_v50 = vadd.f32 %v1290_v49, %v982_v45 }
 0x365   : > { %v1221_v24 = vpop.f32.mrf.mxu0  ;;  %v1292_v37 = vpop.f32.mrf.mxu1 }
 0x366   : > { %v2295_v51 = vadd.f32 %v1221_v24, %v982_v45  ;;  %v2297_v41 = vadd.f32 %v1292_v37, %v982_v45 }
 0x367   : > { %v1300_v52 = vsel %vm514_vm2, %v2283_v48, 0.0  ;;  %v1301_v53 = vsel %vm514_vm2, %v2287_v29, 0.0  ;;  %v1303_v54 = vsel %vm514_vm2, %v2285_v28, 0.0  ;;  %v1305_v56 = vsel %vm514_vm2, %v2289_v33, 0.0  ;;  %v1299_v30 = vld [vmem:[#allocation2 + $0x4] sm:$0xf] }
 0x368   : > { %v1302_v55 = vadd.f32 %v1301_v53, %v1300_v52  ;;  %v1322_v57 = vmul.f32 %v2283_v48, %v2283_v48  ;;  %v1323_v58 = vmul.f32 %v2287_v29, %v2287_v29  ;;  %v1324_v59 = vmul.f32 %v2285_v28, %v2285_v28  ;;  %v1321_v35 = vld [vmem:[#allocation3 + $0x4] sm:$0xf] }
 0x369   : > { %v1325_v61 = vmul.f32 %v2289_v33, %v2289_v33  ;;  %v1307_v62 = vsel %vm514_vm2, %v2291_v40, 0.0  ;;  %v1326_v63 = vmul.f32 %v2291_v40, %v2291_v40  ;;  %v1309_v6 = vsel %vm514_vm2, %v2295_v51, 0.0 }
 0x36a   : > { %v1304_v60 = vadd.f32 %v1303_v54, %v1302_v55  ;;  %v1330_v0 = vsel %vm514_vm2, %v1322_v57, 0.0  ;;  %v1331_v1 = vsel %vm514_vm2, %v1323_v58, 0.0  ;;  %v1333_v5 = vsel %vm514_vm2, %v1324_v59, 0.0 }
 0x36b   : > { %v1332_v4 = vadd.f32 %v1331_v1, %v1330_v0  ;;  %v1327_v7 = vmul.f32 %v2295_v51, %v2295_v51  ;;  %v1335_v8 = vsel %vm514_vm2, %v1325_v61, 0.0  ;;  %v1311_v11 = vsel %vm514_vm2, %v2293_v50, 0.0 }
 0x36c   : > { %v1306_v3 = vadd.f32 %v1305_v56, %v1304_v60  ;;  %v1328_v12 = vmul.f32 %v2293_v50, %v2293_v50  ;;  %v1337_v13 = vsel %vm514_vm2, %v1326_v63, 0.0  ;;  %v1313_v16 = vsel %vm514_vm2, %v2297_v41, 0.0 }
 0x36d   : > { %v1334_v10 = vadd.f32 %v1333_v5, %v1332_v4  ;;  %v1329_v17 = vmul.f32 %v2297_v41, %v2297_v41  ;;  %v1339_v18 = vsel %vm514_vm2, %v1327_v7, 0.0  ;;  %vm1318_vm5 = vcmask 3072  }
 0x36e   : > { %v1308_v9 = vadd.f32 %v1307_v62, %v1306_v3  ;;  %v1341_v21 = vsel %vm514_vm2, %v1328_v12, 0.0 }
 0x36f   : > { %v1336_v15 = vadd.f32 %v1335_v8, %v1334_v10  ;;  %v1343_v25 = vsel %vm514_vm2, %v1329_v17, 0.0 }
 0x370   : > { %v1310_v14 = vadd.f32 %v1309_v6, %v1308_v9 }
 0x371   : > { %v1338_v20 = vadd.f32 %v1337_v13, %v1336_v15 }
 0x372   : > { %v1312_v19 = vadd.f32 %v1311_v11, %v1310_v14 }
 0x373   : > { %v1340_v23 = vadd.f32 %v1339_v18, %v1338_v20 }
 0x374   : > { %v1314_v22 = vadd.f32 %v1313_v16, %v1312_v19 }
 0x375   : > { %v1342_v26 = vadd.f32 %v1341_v21, %v1340_v23 }
 0x376   : > { %1315 = vadd.xlane.f32.xlu0 %v1314_v22 }
 0x377   : > { %v1344_v27 = vadd.f32 %v1343_v25, %v1342_v26 }
 0x37a   : > { %1345 = vadd.xlane.f32.xlu0 %v1344_v27 }
 0x3ff   : > { %v1316_v31 = vpop.xlane.xlu0 %1315 }
 0x400   : > { %v1317_v34 = vadd.f32 %v1316_v31, %v1299_v30 }
 0x402   : > { %1319 = vst.msk [vmem:[#allocation2 + $0x4] sm:$0xf] %vm1318_vm5, %v1317_v34 }
 0x403   : > { %v1346_v38 = vpop.xlane.xlu0 %1345 }
 0x404   : > { %v1347_v39 = vadd.f32 %v1346_v38, %v1321_v35 }
 0x406   : > { %1348 = vst.msk [vmem:[#allocation3 + $0x4] sm:$0xf] %vm1318_vm5, %v1347_v39 }
 0x407 PF: > { %1351 = sbr.rel (%p1542_p6) target bundleno = 1174 (0x496), region = 87 }
 0x40c   : > { %v1353_v42 = vld [vmem:[#allocation4 + $0x4] sm:$0xf]  ;;  %v1773_v43 = vmov 0   ;;  %v1368_v44 = vld [vmem:[#allocation5 + $0x4] sm:$0xf] }
 0x40d   : > { %1696 = vset.pattern.permute.xlu0 %v1773_v43 }
 0x40e   : > { %1356 = vperm.xlu0 %1696, %v1353_v42  }
 0x412   : > { %1371 = vperm.xlu0 %1696, %v1368_v44  }
 0x489   : > { %v1357_v45 = vpop.permute.xlu0 %1356 }
 0x48a   : > { %v1359_v46 = vmul.f32 %v1357_v45, %v2283_v48  ;;  %v1360_v47 = vmul.f32 %v1357_v45, %v2287_v29  ;;  %v1361_v32 = vmul.f32 %v1357_v45, %v2285_v28  ;;  %v1362_v2 = vmul.f32 %v1357_v45, %v2289_v33 }
 0x48b   : > { %v1363_v36 = vmul.f32 %v1357_v45, %v2291_v40  ;;  %v1364_v49 = vmul.f32 %v1357_v45, %v2295_v51  ;;  %v1365_v24 = vmul.f32 %v1357_v45, %v2293_v50  ;;  %v1366_v37 = vmul.f32 %v1357_v45, %v2297_v41 }
 0x48d   : > { %v1372_v52 = vpop.permute.xlu0 %1371 }
 0x48e   : > { %v1374_v53 = vadd.f32 %v1372_v52, %v1359_v46  ;;  %v1375_v54 = vadd.f32 %v1372_v52, %v1360_v47  ;;  %v1376_v55 = vadd.f32 %v1372_v52, %v1361_v32  ;;  %v1377_v56 = vadd.f32 %v1372_v52, %v1362_v2 }
 0x48f   : > { %v1378_v48 = vadd.f32 %v1372_v52, %v1363_v36  ;;  %v1379_v29 = vadd.f32 %v1372_v52, %v1364_v49  ;;  %v1380_v28 = vadd.f32 %v1372_v52, %v1365_v24  ;;  %v1381_v33 = vadd.f32 %v1372_v52, %v1366_v37 }
 0x490   : > { %v1382_v40 = vmax.f32 %v1374_v53, 0.0  ;;  %v1383_v57 = vmax.f32 %v1375_v54, 0.0  ;;  %v1384_v51 = vmax.f32 %v1376_v55, 0.0  ;;  %v1385_v58 = vmax.f32 %v1377_v56, 0.0 }
 0x491   : > { %v1386_v50 = vmax.f32 %v1378_v48, 0.0  ;;  %v1387_v59 = vmax.f32 %v1379_v29, 0.0  ;;  %v1388_v41 = vmax.f32 %v1380_v28, 0.0  ;;  %v1389_v60 = vmax.f32 %v1381_v33, 0.0 }
 0x492   : > { %v1398_v61 = vcombine.low %v1382_v40, %v1383_v57  ;;  %v1399_v62 = vcombine.low %v1384_v51, %v1385_v58 }
 0x493   : > { %v1400_v63 = vcombine.low %v1386_v50, %v1387_v59  ;;  %v1401_v0 = vcombine.low %v1388_v41, %v1389_v60 }
 0x494   : > { %1599 = vst [vmem:[%s2066_s16 + $0x20] sm:$0xff] %v1398_v61  ;;  %1600 = vst [vmem:[%s2066_s16 + $0x28] sm:$0xff] %v1399_v62 }
 0x495   : > { %1601 = vst [vmem:[%s2066_s16 + $0x30] sm:$0xff] %v1400_v63  ;;  %1602 = vst [vmem:[%s2066_s16 + $0x38] sm:$0xff] %v1401_v0 }
 0x496 PF: > { %1417 = sbr.rel (!%p1877_p9) target bundleno = 1183 (0x49f), region = 91  ;;  %v1434_v1 = vld [vmem:[%s2066_s16] sm:$0xff] (%p1877_p9)  ;;  %v1436_v3 = vld [vmem:[%s2066_s16 + $0x8] sm:$0xff] (%p1877_p9)  ;;  %v1438_v4 = vld [vmem:[%s2066_s16 + $0x10] sm:$0xff] (%p1877_p9) }
 0x497   : > { %s1418_s15 = smul.u32 (%p1877_p9), %s1751_s22, %s1755_s23  ;;  %v1440_v5 = vld [vmem:[%s2066_s16 + $0x18] sm:$0xff] (%p1877_p9) }
 0x499   : > { %s1609_s6 = sshll.u32 (%p1877_p9), %s1418_s15, 5 }
 0x49a   : > { %s1421_s8 = scalar_lea.vmem (%p1877_p9), %s2402_s5, %s1609_s6 }
 0x49b   : > { %v1442_v6 = vld [vmem:[%s2066_s16 + $0x20] sm:$0xff]  ;;  %v1444_v7 = vld [vmem:[%s2066_s16 + $0x28] sm:$0xff]  ;;  %1435 = vst [vmem:[%s1421_s8] sm:$0xff] %v1434_v1  ;;  %1437 = vst [vmem:[%s1421_s8 + $0x8] sm:$0xff] %v1436_v3 }
 0x49c   : > { %v1446_v8 = vld [vmem:[%s2066_s16 + $0x30] sm:$0xff]  ;;  %v1448_v9 = vld [vmem:[%s2066_s16 + $0x38] sm:$0xff]  ;;  %1439 = vst [vmem:[%s1421_s8 + $0x10] sm:$0xff] %v1438_v4  ;;  %1441 = vst [vmem:[%s1421_s8 + $0x18] sm:$0xff] %v1440_v5 }
 0x49d   : > { %1443 = vst [vmem:[%s1421_s8 + $0x40] sm:$0xff] %v1442_v6  ;;  %1445 = vst [vmem:[%s1421_s8 + $0x48] sm:$0xff] %v1444_v7 }
 0x49e   : > { %1447 = vst [vmem:[%s1421_s8 + $0x50] sm:$0xff] %v1446_v8  ;;  %1449 = vst [vmem:[%s1421_s8 + $0x58] sm:$0xff] %v1448_v9 }
 0x49f PF: > { %s15_s26 = sadd.s32 1, %s1767_s26   ;;  %s2405_s18 = smov %s1739_s19 }
 0x4a0   : > { %p12_p7 = scmp.ge.s32.totalorder %s15_s26, 6   ;;  %s2406_s19 = smov %s1882_s14 }
 0x4a1   : > { %s2407_s20 = smov %s1747_s21  ;;  %s2408_s21 = smov %s1870_s9 }
 0x4a2   : > { %s2409_s22 = smov %s1759_s24  ;;  %s2410_s23 = smov %s1763_s25 }
 0x4a3   : > { %s2411_s24 = smov %s2414_s28  ;;  %s2412_s25 = smov %s2418_s29 }
 0x4a4   :  { %14 = sbr.rel (!%p12_p7) target bundleno = 5 (0x5), region = 153 }

</bundles_post_ra>
